<compile_context>
chip_gen: v7x
topology: tpu7x:2x2x1
jax: 0.10.0
libtpu: 0.0.40
codegen_flags: <defaults>
</compile_context>

<pallas_src>
import functools

import jax
import jax.numpy as jnp
from jax.experimental import pallas as pl
from jax.experimental.pallas import tpu as pltpu


IN_N = 2      # Deep-Ritz 2-D square domain input
M = 32        # width of the block layers
OUT_N = 1     # scalar PDE solution output
DEPTH = 4     # number of residual blocks


def drrnn_kernel(x_ref, w_in_ref, b_in_ref,
                 w1_ref, b1_ref, w2_ref, b2_ref,
                 w_out_ref, b_out_ref, o_ref, *, depth, bf16_tanh):
    """All refs are in the lane-packed layout (4 batch rows per vreg row)."""

    def act(z):
        if bf16_tanh:
            # v6e/v7x only: EUP is bf16-capable -> ~2x tanh throughput.
            return jnp.tanh(z.astype(jnp.bfloat16)).astype(jnp.float32)
        return jnp.tanh(z)

    # input Linear (packed): (tbp, pack*in_N) @ (pack*in_N, pack*m)
    h = jnp.dot(x_ref[...], w_in_ref[...],
                preferred_element_type=jnp.float32) + b_in_ref[...]

    # residual blocks: tanh(L2(tanh(L1(h)))) + h   (block-diag packed weights)
    for d in range(depth):  # static small unroll
        t = act(jnp.dot(h, w1_ref[d], preferred_element_type=jnp.float32)
                + b1_ref[d])
        t = act(jnp.dot(t, w2_ref[d], preferred_element_type=jnp.float32)
                + b2_ref[d])
        h = t + h

    # output Linear (packed): (tbp, pack*m) @ (pack*m, pack*out_N)
    out = jnp.dot(h, w_out_ref[...],
                  preferred_element_type=jnp.float32) + b_out_ref[...]
    o_ref[...] = out.astype(o_ref.dtype)


@functools.partial(jax.jit, static_argnames=("tb", "bf16_tanh"))
def drrnn_forward(x, params, *, tb=512, bf16_tanh=False):
    w_in, b_in, w1, b1, w2, b2, w_out, b_out = params

    N, in_n = x.shape
    m = w_in.shape[1]
    out_n = w_out.shape[1]
    depth = w1.shape[0]

    # Pack `pack` batch rows along the 128-lane axis (pack=4 for m=32).
    pack = max(1, 128 // m)
    mp = pack * m
    if tb % (pack * 8) != 0:
        raise ValueError("tb must be a multiple of pack*8 (=%d)" % (pack * 8))
    tbp = tb // pack                      # packed rows per tile

    # Pad the batch so no tail rows are dropped; pad rows are sliced off below.
    n_pad = pl.cdiv(N, tb) * tb
    x_pad = jnp.pad(x.astype(jnp.float32), ((0, n_pad - N), (0, 0)))
    x_packed = x_pad.reshape(n_pad // pack, pack * in_n)
    rows_p = n_pad // pack

    # Block-diagonal (kron) weights + lane-tiled biases: numerically identical
    # to the unpacked network, but every vreg lane is used.
    eye = jnp.eye(pack, dtype=jnp.float32)
    bd = lambda w: jnp.kron(eye, w.astype(jnp.float32))
    w_in_p = bd(w_in)                     # (pack*in_n, mp)
    w1_p = jax.vmap(bd)(w1)               # (depth, mp, mp)
    w2_p = jax.vmap(bd)(w2)               # (depth, mp, mp)
    w_out_p = bd(w_out)                   # (mp, pack*out_n)
    b_in_p = jnp.tile(b_in.astype(jnp.float32), (1, pack))        # (1, mp)
    b1_p = jnp.tile(b1.astype(jnp.float32), (1, 1, pack))         # (depth,1,mp)
    b2_p = jnp.tile(b2.astype(jnp.float32), (1, 1, pack))         # (depth,1,mp)
    b_out_p = jnp.tile(b_out.astype(jnp.float32), (1, pack))      # (1, pack*out_n)

    grid = (n_pad // tb,)

    # weights/biases are replicated across the batch grid (index_map -> block 0)
    full = lambda shape: pl.BlockSpec(shape, lambda i: (0,) * len(shape))

    # Advisory cost estimate so XLA schedules the surrounding graph sensibly.
    flops = (2 * rows_p * (pack * in_n) * mp
             + depth * 2 * 2 * rows_p * mp * mp
             + 2 * rows_p * mp * (pack * out_n))
    transcendentals = depth * 2 * rows_p * mp
    weight_bytes = 4 * (w_in_p.size + b_in_p.size + w1_p.size + b1_p.size
                        + w2_p.size + b2_p.size + w_out_p.size + b_out_p.size)
    bytes_accessed = 4 * (x_packed.size + rows_p * pack * out_n) + weight_bytes

    out_packed = pl.pallas_call(
        functools.partial(drrnn_kernel, depth=depth, bf16_tanh=bf16_tanh),
        out_shape=jax.ShapeDtypeStruct((rows_p, pack * out_n), jnp.float32),
        grid_spec=pltpu.PrefetchScalarGridSpec(
            num_scalar_prefetch=0,
            grid=grid,
            in_specs=[
                pl.BlockSpec((tbp, pack * in_n), lambda i: (i, 0)),  # x tile
                full((pack * in_n, mp)), full((1, mp)),              # input Linear
                full((depth, mp, mp)), full((depth, 1, mp)),         # Block L1
                full((depth, mp, mp)), full((depth, 1, mp)),         # Block L2
                full((mp, pack * out_n)), full((1, pack * out_n)),   # output Linear
            ],
            out_specs=pl.BlockSpec((tbp, pack * out_n), lambda i: (i, 0)),
        ),
        compiler_params=pltpu.CompilerParams(
            dimension_semantics=("parallel",)),
        cost_estimate=pl.CostEstimate(flops=flops,
                                      transcendentals=transcendentals,
                                      bytes_accessed=bytes_accessed),
    )(x_packed, w_in_p, b_in_p, w1_p, b1_p, w2_p, b2_p, w_out_p, b_out_p)

    # Unpack: packed row rp, group g  ->  original row rp*pack + g.
    return out_packed.reshape(n_pad, out_n)[:N]


def init_params(key):
    ks = jax.random.split(key, 8)
    scale = 0.2
    w_in = scale * jax.random.normal(ks[0], (IN_N, M), jnp.float32)
    b_in = scale * jax.random.normal(ks[1], (1, M), jnp.float32)
    w1 = scale * jax.random.normal(ks[2], (DEPTH, M, M), jnp.float32)
    b1 = scale * jax.random.normal(ks[3], (DEPTH, 1, M), jnp.float32)
    w2 = scale * jax.random.normal(ks[4], (DEPTH, M, M), jnp.float32)
    b2 = scale * jax.random.normal(ks[5], (DEPTH, 1, M), jnp.float32)
    w_out = scale * jax.random.normal(ks[6], (M, OUT_N), jnp.float32)
    b_out = scale * jax.random.normal(ks[7], (1, OUT_N), jnp.float32)
    return (w_in, b_in, w1, b1, w2, b2, w_out, b_out)


def drrnn_reference(x, params):
    """Pure-JAX reference mirroring the PyTorch forward."""
    w_in, b_in, w1, b1, w2, b2, w_out, b_out = params
    h = x @ w_in + b_in
    for d in range(DEPTH):
        t = jnp.tanh(h @ w1[d] + b1[d])
        t = jnp.tanh(t @ w2[d] + b2[d])
        h = t + h
    return h @ w_out + b_out


if __name__ == "__main__":
    key = jax.random.PRNGKey(0)
    k_x, k_p = jax.random.split(key)

    # Batch of collocation points; deliberately NOT a multiple of the tile so
    # the padding path is exercised.
    N = 200
    x = jax.random.uniform(k_x, (N, IN_N), jnp.float32, minval=-1.0, maxval=1.0)
    params = init_params(k_p)

    # f32 path (portable across v5e/v6e/v7x and matches the f32 reference).
    # On v6e/v7x, bf16_tanh=True roughly doubles EUP throughput (loosen tol).
    out = drrnn_forward(x, params)
    out = jax.block_until_ready(out)

    ref = drrnn_reference(x, params)
    assert out.shape == (N, OUT_N)
    assert jnp.allclose(out, ref, atol=1e-4, rtol=1e-4), "mismatch vs reference"

    print("KERNEL_OK")
</pallas_src>

<mosaic_0001>
module attributes {stable_mosaic.version = 11 : i64} {
  func.func @drrnn_kernel(%arg0: i32, %arg1: memref<128x8xf32, #tpu.memory_space<vmem>>, %arg2: memref<8x128xf32, #tpu.memory_space<vmem>>, %arg3: memref<1x128xf32, #tpu.memory_space<vmem>>, %arg4: memref<4x128x128xf32, #tpu.memory_space<vmem>>, %arg5: memref<4x1x128xf32, #tpu.memory_space<vmem>>, %arg6: memref<4x128x128xf32, #tpu.memory_space<vmem>>, %arg7: memref<4x1x128xf32, #tpu.memory_space<vmem>>, %arg8: memref<128x4xf32, #tpu.memory_space<vmem>>, %arg9: memref<1x4xf32, #tpu.memory_space<vmem>>, %arg10: memref<128x4xf32, #tpu.memory_space<vmem>>) attributes {dimension_semantics = [#tpu.dimension_semantics<parallel>], iteration_bounds = array<i64: 1>, scalar_prefetch = 0 : i64, scratch_operands = 0 : i64, tpu.core_type = #tpu.core_type<tc>, window_params = [{transform_indices = @transform_0, window_bounds = array<i64: 128, 8>}, {pipeline_mode = #tpu.pipeline_mode<synchronous>, transform_indices = @transform_1, window_bounds = array<i64: 8, 128>}, {pipeline_mode = #tpu.pipeline_mode<synchronous>, transform_indices = @transform_2, window_bounds = array<i64: 1, 128>}, {pipeline_mode = #tpu.pipeline_mode<synchronous>, transform_indices = @transform_3, window_bounds = array<i64: 4, 128, 128>}, {pipeline_mode = #tpu.pipeline_mode<synchronous>, transform_indices = @transform_4, window_bounds = array<i64: 4, 1, 128>}, {pipeline_mode = #tpu.pipeline_mode<synchronous>, transform_indices = @transform_5, window_bounds = array<i64: 4, 128, 128>}, {pipeline_mode = #tpu.pipeline_mode<synchronous>, transform_indices = @transform_6, window_bounds = array<i64: 4, 1, 128>}, {pipeline_mode = #tpu.pipeline_mode<synchronous>, transform_indices = @transform_7, window_bounds = array<i64: 128, 4>}, {pipeline_mode = #tpu.pipeline_mode<synchronous>, transform_indices = @transform_8, window_bounds = array<i64: 1, 4>}, {transform_indices = @transform_9, window_bounds = array<i64: 128, 4>}]} {
    %c0 = arith.constant 0 : index
    %c0_0 = arith.constant 0 : index
    %0 = vector.load %arg1[%c0, %c0_0] : memref<128x8xf32, #tpu.memory_space<vmem>>, vector<128x8xf32>
    %c0_1 = arith.constant 0 : index
    %c0_2 = arith.constant 0 : index
    %1 = vector.load %arg2[%c0_1, %c0_2] : memref<8x128xf32, #tpu.memory_space<vmem>>, vector<8x128xf32>
    %cst = arith.constant dense<0.000000e+00> : vector<128x128xf32>
    %2 = tpu.matmul %0, %1, %cst {dimension_numbers = #tpu.dot_dimension_numbers<[1], [0], [0], [1], [0, 0, 1, 1], [], []>} : vector<128x8xf32>, vector<8x128xf32>, vector<128x128xf32> -> vector<128x128xf32>
    %c0_3 = arith.constant 0 : index
    %c0_4 = arith.constant 0 : index
    %3 = vector.load %arg3[%c0_3, %c0_4] : memref<1x128xf32, #tpu.memory_space<vmem>>, vector<1x128xf32>
    %4 = vector.broadcast %3 : vector<1x128xf32> to vector<128x128xf32>
    %5 = arith.addf %2, %4 : vector<128x128xf32>
    %c0_5 = arith.constant 0 : index
    %c0_6 = arith.constant 0 : index
    %c0_7 = arith.constant 0 : index
    %6 = vector.load %arg4[%c0_5, %c0_6, %c0_7] : memref<4x128x128xf32, #tpu.memory_space<vmem>>, vector<1x128x128xf32>
    %7 = vector.shape_cast %6 : vector<1x128x128xf32> to vector<128x128xf32>
    %cst_8 = arith.constant dense<0.000000e+00> : vector<128x128xf32>
    %8 = tpu.matmul %5, %7, %cst_8 {dimension_numbers = #tpu.dot_dimension_numbers<[1], [0], [0], [1], [0, 0, 1, 1], [], []>} : vector<128x128xf32>, vector<128x128xf32>, vector<128x128xf32> -> vector<128x128xf32>
    %c0_9 = arith.constant 0 : index
    %c0_10 = arith.constant 0 : index
    %c0_11 = arith.constant 0 : index
    %9 = vector.load %arg5[%c0_9, %c0_10, %c0_11] : memref<4x1x128xf32, #tpu.memory_space<vmem>>, vector<1x1x128xf32>
    %10 = vector.shape_cast %9 : vector<1x1x128xf32> to vector<1x128xf32>
    %11 = vector.broadcast %10 : vector<1x128xf32> to vector<128x128xf32>
    %12 = arith.addf %8, %11 : vector<128x128xf32>
    %13 = math.tanh %12 : vector<128x128xf32>
    %c0_12 = arith.constant 0 : index
    %c0_13 = arith.constant 0 : index
    %c0_14 = arith.constant 0 : index
    %14 = vector.load %arg6[%c0_12, %c0_13, %c0_14] : memref<4x128x128xf32, #tpu.memory_space<vmem>>, vector<1x128x128xf32>
    %15 = vector.shape_cast %14 : vector<1x128x128xf32> to vector<128x128xf32>
    %cst_15 = arith.constant dense<0.000000e+00> : vector<128x128xf32>
    %16 = tpu.matmul %13, %15, %cst_15 {dimension_numbers = #tpu.dot_dimension_numbers<[1], [0], [0], [1], [0, 0, 1, 1], [], []>} : vector<128x128xf32>, vector<128x128xf32>, vector<128x128xf32> -> vector<128x128xf32>
    %c0_16 = arith.constant 0 : index
    %c0_17 = arith.constant 0 : index
    %c0_18 = arith.constant 0 : index
    %17 = vector.load %arg7[%c0_16, %c0_17, %c0_18] : memref<4x1x128xf32, #tpu.memory_space<vmem>>, vector<1x1x128xf32>
    %18 = vector.shape_cast %17 : vector<1x1x128xf32> to vector<1x128xf32>
    %19 = vector.broadcast %18 : vector<1x128xf32> to vector<128x128xf32>
    %20 = arith.addf %16, %19 : vector<128x128xf32>
    %21 = math.tanh %20 : vector<128x128xf32>
    %22 = arith.addf %21, %5 : vector<128x128xf32>
    %c1 = arith.constant 1 : index
    %c0_19 = arith.constant 0 : index
    %c0_20 = arith.constant 0 : index
    %23 = vector.load %arg4[%c1, %c0_19, %c0_20] : memref<4x128x128xf32, #tpu.memory_space<vmem>>, vector<1x128x128xf32>
    %24 = vector.shape_cast %23 : vector<1x128x128xf32> to vector<128x128xf32>
    %cst_21 = arith.constant dense<0.000000e+00> : vector<128x128xf32>
    %25 = tpu.matmul %22, %24, %cst_21 {dimension_numbers = #tpu.dot_dimension_numbers<[1], [0], [0], [1], [0, 0, 1, 1], [], []>} : vector<128x128xf32>, vector<128x128xf32>, vector<128x128xf32> -> vector<128x128xf32>
    %c1_22 = arith.constant 1 : index
    %c0_23 = arith.constant 0 : index
    %c0_24 = arith.constant 0 : index
    %26 = vector.load %arg5[%c1_22, %c0_23, %c0_24] : memref<4x1x128xf32, #tpu.memory_space<vmem>>, vector<1x1x128xf32>
    %27 = vector.shape_cast %26 : vector<1x1x128xf32> to vector<1x128xf32>
    %28 = vector.broadcast %27 : vector<1x128xf32> to vector<128x128xf32>
    %29 = arith.addf %25, %28 : vector<128x128xf32>
    %30 = math.tanh %29 : vector<128x128xf32>
    %c1_25 = arith.constant 1 : index
    %c0_26 = arith.constant 0 : index
    %c0_27 = arith.constant 0 : index
    %31 = vector.load %arg6[%c1_25, %c0_26, %c0_27] : memref<4x128x128xf32, #tpu.memory_space<vmem>>, vector<1x128x128xf32>
    %32 = vector.shape_cast %31 : vector<1x128x128xf32> to vector<128x128xf32>
    %cst_28 = arith.constant dense<0.000000e+00> : vector<128x128xf32>
    %33 = tpu.matmul %30, %32, %cst_28 {dimension_numbers = #tpu.dot_dimension_numbers<[1], [0], [0], [1], [0, 0, 1, 1], [], []>} : vector<128x128xf32>, vector<128x128xf32>, vector<128x128xf32> -> vector<128x128xf32>
    %c1_29 = arith.constant 1 : index
    %c0_30 = arith.constant 0 : index
    %c0_31 = arith.constant 0 : index
    %34 = vector.load %arg7[%c1_29, %c0_30, %c0_31] : memref<4x1x128xf32, #tpu.memory_space<vmem>>, vector<1x1x128xf32>
    %35 = vector.shape_cast %34 : vector<1x1x128xf32> to vector<1x128xf32>
    %36 = vector.broadcast %35 : vector<1x128xf32> to vector<128x128xf32>
    %37 = arith.addf %33, %36 : vector<128x128xf32>
    %38 = math.tanh %37 : vector<128x128xf32>
    %39 = arith.addf %38, %22 : vector<128x128xf32>
    %c2 = arith.constant 2 : index
    %c0_32 = arith.constant 0 : index
    %c0_33 = arith.constant 0 : index
    %40 = vector.load %arg4[%c2, %c0_32, %c0_33] : memref<4x128x128xf32, #tpu.memory_space<vmem>>, vector<1x128x128xf32>
    %41 = vector.shape_cast %40 : vector<1x128x128xf32> to vector<128x128xf32>
    %cst_34 = arith.constant dense<0.000000e+00> : vector<128x128xf32>
    %42 = tpu.matmul %39, %41, %cst_34 {dimension_numbers = #tpu.dot_dimension_numbers<[1], [0], [0], [1], [0, 0, 1, 1], [], []>} : vector<128x128xf32>, vector<128x128xf32>, vector<128x128xf32> -> vector<128x128xf32>
    %c2_35 = arith.constant 2 : index
    %c0_36 = arith.constant 0 : index
    %c0_37 = arith.constant 0 : index
    %43 = vector.load %arg5[%c2_35, %c0_36, %c0_37] : memref<4x1x128xf32, #tpu.memory_space<vmem>>, vector<1x1x128xf32>
    %44 = vector.shape_cast %43 : vector<1x1x128xf32> to vector<1x128xf32>
    %45 = vector.broadcast %44 : vector<1x128xf32> to vector<128x128xf32>
    %46 = arith.addf %42, %45 : vector<128x128xf32>
    %47 = math.tanh %46 : vector<128x128xf32>
    %c2_38 = arith.constant 2 : index
    %c0_39 = arith.constant 0 : index
    %c0_40 = arith.constant 0 : index
    %48 = vector.load %arg6[%c2_38, %c0_39, %c0_40] : memref<4x128x128xf32, #tpu.memory_space<vmem>>, vector<1x128x128xf32>
    %49 = vector.shape_cast %48 : vector<1x128x128xf32> to vector<128x128xf32>
    %cst_41 = arith.constant dense<0.000000e+00> : vector<128x128xf32>
    %50 = tpu.matmul %47, %49, %cst_41 {dimension_numbers = #tpu.dot_dimension_numbers<[1], [0], [0], [1], [0, 0, 1, 1], [], []>} : vector<128x128xf32>, vector<128x128xf32>, vector<128x128xf32> -> vector<128x128xf32>
    %c2_42 = arith.constant 2 : index
    %c0_43 = arith.constant 0 : index
    %c0_44 = arith.constant 0 : index
    %51 = vector.load %arg7[%c2_42, %c0_43, %c0_44] : memref<4x1x128xf32, #tpu.memory_space<vmem>>, vector<1x1x128xf32>
    %52 = vector.shape_cast %51 : vector<1x1x128xf32> to vector<1x128xf32>
    %53 = vector.broadcast %52 : vector<1x128xf32> to vector<128x128xf32>
    %54 = arith.addf %50, %53 : vector<128x128xf32>
    %55 = math.tanh %54 : vector<128x128xf32>
    %56 = arith.addf %55, %39 : vector<128x128xf32>
    %c3 = arith.constant 3 : index
    %c0_45 = arith.constant 0 : index
    %c0_46 = arith.constant 0 : index
    %57 = vector.load %arg4[%c3, %c0_45, %c0_46] : memref<4x128x128xf32, #tpu.memory_space<vmem>>, vector<1x128x128xf32>
    %58 = vector.shape_cast %57 : vector<1x128x128xf32> to vector<128x128xf32>
    %cst_47 = arith.constant dense<0.000000e+00> : vector<128x128xf32>
    %59 = tpu.matmul %56, %58, %cst_47 {dimension_numbers = #tpu.dot_dimension_numbers<[1], [0], [0], [1], [0, 0, 1, 1], [], []>} : vector<128x128xf32>, vector<128x128xf32>, vector<128x128xf32> -> vector<128x128xf32>
    %c3_48 = arith.constant 3 : index
    %c0_49 = arith.constant 0 : index
    %c0_50 = arith.constant 0 : index
    %60 = vector.load %arg5[%c3_48, %c0_49, %c0_50] : memref<4x1x128xf32, #tpu.memory_space<vmem>>, vector<1x1x128xf32>
    %61 = vector.shape_cast %60 : vector<1x1x128xf32> to vector<1x128xf32>
    %62 = vector.broadcast %61 : vector<1x128xf32> to vector<128x128xf32>
    %63 = arith.addf %59, %62 : vector<128x128xf32>
    %64 = math.tanh %63 : vector<128x128xf32>
    %c3_51 = arith.constant 3 : index
    %c0_52 = arith.constant 0 : index
    %c0_53 = arith.constant 0 : index
    %65 = vector.load %arg6[%c3_51, %c0_52, %c0_53] : memref<4x128x128xf32, #tpu.memory_space<vmem>>, vector<1x128x128xf32>
    %66 = vector.shape_cast %65 : vector<1x128x128xf32> to vector<128x128xf32>
    %cst_54 = arith.constant dense<0.000000e+00> : vector<128x128xf32>
    %67 = tpu.matmul %64, %66, %cst_54 {dimension_numbers = #tpu.dot_dimension_numbers<[1], [0], [0], [1], [0, 0, 1, 1], [], []>} : vector<128x128xf32>, vector<128x128xf32>, vector<128x128xf32> -> vector<128x128xf32>
    %c3_55 = arith.constant 3 : index
    %c0_56 = arith.constant 0 : index
    %c0_57 = arith.constant 0 : index
    %68 = vector.load %arg7[%c3_55, %c0_56, %c0_57] : memref<4x1x128xf32, #tpu.memory_space<vmem>>, vector<1x1x128xf32>
    %69 = vector.shape_cast %68 : vector<1x1x128xf32> to vector<1x128xf32>
    %70 = vector.broadcast %69 : vector<1x128xf32> to vector<128x128xf32>
    %71 = arith.addf %67, %70 : vector<128x128xf32>
    %72 = math.tanh %71 : vector<128x128xf32>
    %73 = arith.addf %72, %56 : vector<128x128xf32>
    %c0_58 = arith.constant 0 : index
    %c0_59 = arith.constant 0 : index
    %74 = vector.load %arg8[%c0_58, %c0_59] : memref<128x4xf32, #tpu.memory_space<vmem>>, vector<128x4xf32>
    %cst_60 = arith.constant dense<0.000000e+00> : vector<128x4xf32>
    %75 = tpu.matmul %73, %74, %cst_60 {dimension_numbers = #tpu.dot_dimension_numbers<[1], [0], [0], [1], [0, 0, 1, 1], [], []>} : vector<128x128xf32>, vector<128x4xf32>, vector<128x4xf32> -> vector<128x4xf32>
    %c0_61 = arith.constant 0 : index
    %c0_62 = arith.constant 0 : index
    %76 = vector.load %arg9[%c0_61, %c0_62] : memref<1x4xf32, #tpu.memory_space<vmem>>, vector<1x4xf32>
    %77 = vector.broadcast %76 : vector<1x4xf32> to vector<128x4xf32>
    %78 = arith.addf %75, %77 : vector<128x4xf32>
    %c0_63 = arith.constant 0 : index
    %c0_64 = arith.constant 0 : index
    %79 = vector.load %arg10[%c0_63, %c0_64] : memref<128x4xf32, #tpu.memory_space<vmem>>, vector<128x4xf32>
    tpu.vector_store %arg10[%c0_63, %c0_64], %78 {strides = array<i32>} : memref<128x4xf32, #tpu.memory_space<vmem>>, vector<128x4xf32>,
    return
  }
  func.func @transform_0(%arg0: i32) -> (i32, i32) {
    %c0_i32 = arith.constant 0 : i32
    %c0_i32_0 = arith.constant 0 : i32
    return %arg0, %c0_i32 : i32, i32
  }
  func.func @transform_1(%arg0: i32) -> (i32, i32) {
    %c0_i32 = arith.constant 0 : i32
    %c0_i32_0 = arith.constant 0 : i32
    %c0_i32_1 = arith.constant 0 : i32
    return %c0_i32, %c0_i32_0 : i32, i32
  }
  func.func @transform_2(%arg0: i32) -> (i32, i32) {
    %c0_i32 = arith.constant 0 : i32
    %c0_i32_0 = arith.constant 0 : i32
    %c0_i32_1 = arith.constant 0 : i32
    return %c0_i32, %c0_i32_0 : i32, i32
  }
  func.func @transform_3(%arg0: i32) -> (i32, i32, i32) {
    %c0_i32 = arith.constant 0 : i32
    %c0_i32_0 = arith.constant 0 : i32
    %c0_i32_1 = arith.constant 0 : i32
    %c0_i32_2 = arith.constant 0 : i32
    return %c0_i32, %c0_i32_0, %c0_i32_1 : i32, i32, i32
  }
  func.func @transform_4(%arg0: i32) -> (i32, i32, i32) {
    %c0_i32 = arith.constant 0 : i32
    %c0_i32_0 = arith.constant 0 : i32
    %c0_i32_1 = arith.constant 0 : i32
    %c0_i32_2 = arith.constant 0 : i32
    return %c0_i32, %c0_i32_0, %c0_i32_1 : i32, i32, i32
  }
  func.func @transform_5(%arg0: i32) -> (i32, i32, i32) {
    %c0_i32 = arith.constant 0 : i32
    %c0_i32_0 = arith.constant 0 : i32
    %c0_i32_1 = arith.constant 0 : i32
    %c0_i32_2 = arith.constant 0 : i32
    return %c0_i32, %c0_i32_0, %c0_i32_1 : i32, i32, i32
  }
  func.func @transform_6(%arg0: i32) -> (i32, i32, i32) {
    %c0_i32 = arith.constant 0 : i32
    %c0_i32_0 = arith.constant 0 : i32
    %c0_i32_1 = arith.constant 0 : i32
    %c0_i32_2 = arith.constant 0 : i32
    return %c0_i32, %c0_i32_0, %c0_i32_1 : i32, i32, i32
  }
  func.func @transform_7(%arg0: i32) -> (i32, i32) {
    %c0_i32 = arith.constant 0 : i32
    %c0_i32_0 = arith.constant 0 : i32
    %c0_i32_1 = arith.constant 0 : i32
    return %c0_i32, %c0_i32_0 : i32, i32
  }
  func.func @transform_8(%arg0: i32) -> (i32, i32) {
    %c0_i32 = arith.constant 0 : i32
    %c0_i32_0 = arith.constant 0 : i32
    %c0_i32_1 = arith.constant 0 : i32
    return %c0_i32, %c0_i32_0 : i32, i32
  }
  func.func @transform_9(%arg0: i32) -> (i32, i32) {
    %c0_i32 = arith.constant 0 : i32
    %c0_i32_0 = arith.constant 0 : i32
    return %arg0, %c0_i32 : i32, i32
  }
}

</mosaic_0001>

<bundles_post_ra>
// kernel: drrnn_forward.1
= control target key start
LH: loop header
LB: loop body
LE: loop exit
PB: predicated region body
PF: predicated region fallthrough
CT: control target
= control target key end

     0   :  { %vm56_vm0 = vcmask 64512   ;;  %vm1966_vm1 = vcmask 31744   ;;  %s4565_s1 = inlined_call_operand.vmem [shape: f32[8,128], index: 1, kind: input, shape index: {}]   ;;  %s4566_s0 = inlined_call_operand.vmem [shape: f32[128,8], index: 0, kind: input, shape index: {}]   ;;  %s4567_s3 = inlined_call_operand.vmem [shape: f32[4,128,128], index: 3, kind: input, shape index: {}]   ;;  %s4568_s5 = inlined_call_operand.vmem [shape: f32[4,128,128], index: 5, kind: input, shape index: {}]   ;;  %s4569_s2 = inlined_call_operand.vmem [shape: f32[1,128], index: 2, kind: input, shape index: {}]   ;;  %s4570_s4 = inlined_call_operand.vmem [shape: f32[4,1,128], index: 4, kind: input, shape index: {}]   ;;  %s4571_s6 = inlined_call_operand.vmem [shape: f32[4,1,128], index: 6, kind: input, shape index: {}]   ;;  %s4572_s7 = inlined_call_operand.vmem [shape: f32[128,4], index: 7, kind: input, shape index: {}]   ;;  %s4573_s8 = inlined_call_operand.vmem [shape: f32[1,4], index: 8, kind: input, shape index: {}]   ;;  %s4574_s9 = inlined_call_operand.vmem [shape: f32[128,4], index: 9, kind: output, shape index: {}]  }
   0x1   :  { %v48_v0 = vld [vmem:[%s4565_s1] sm:$0xff]  ;;  %v33_v2 = vld [vmem:[%s4566_s0 + $0x8] sm:$0xff]  ;;  %v34_v3 = vld [vmem:[%s4566_s0 + $0x10] sm:$0xff] }
   0x2   :  { %v32_v1 = vld [vmem:[%s4566_s0] sm:$0xff]  ;;  %2420 = vmatprep.subr.mxu0 %v48_v0  ;;  %v35_v4 = vld [vmem:[%s4566_s0 + $0x18] sm:$0xff]  ;;  %v251_v7 = vld [vmem:[%s4567_s3 + $0x8] sm:$0xff] }
   0x3   :  { %2422 = vmatprep.mubr.msk.f32.mxu0 %vm56_vm0, %v32_v1  ;;  %2421 = vmatpush3.msra.mxu0 %v48_v0  ;;  %v36_v5 = vld [vmem:[%s4566_s0 + $0x20] sm:$0xff]  ;;  %v252_v8 = vld [vmem:[%s4567_s3 + $0x10] sm:$0xff]  ;;  %v253_v9 = vld [vmem:[%s4567_s3 + $0x18] sm:$0xff] }
   0x4   :  { %2423 = vmatmul.mubr.msk.f32.vlgmr.msra.gmra.mrb[0].mxu0 %vm56_vm0, %v33_v2  ;;  %v250_v6 = vld [vmem:[%s4567_s3] sm:$0xff]  ;;  %v2954_v11 = vpack.c.bf16 %v253_v9, %v252_v8  ;;  %v37_v12 = vld [vmem:[%s4566_s0 + $0x28] sm:$0xff]  ;;  %v38_v15 = vld [vmem:[%s4566_s0 + $0x30] sm:$0xff] }
   0x5   :  { %2425 = vmatprep.mubr.msk.f32.mxu0 %vm56_vm0, %v34_v3  ;;  %v2950_v10 = vpack.c.bf16 %v251_v7, %v250_v6  ;;  %v254_v13 = vld [vmem:[%s4567_s3 + $0x20] sm:$0xff]  ;;  %v255_v14 = vld [vmem:[%s4567_s3 + $0x28] sm:$0xff]  ;;  %v39_v17 = vld [vmem:[%s4566_s0 + $0x38] sm:$0xff] }
   0x6   :  { %v2958_v16 = vpack.c.bf16 %v255_v14, %v254_v13  ;;  %v256_v18 = vld [vmem:[%s4567_s3 + $0x30] sm:$0xff]  ;;  %v257_v19 = vld [vmem:[%s4567_s3 + $0x38] sm:$0xff]  ;;  %v40_v20 = vld [vmem:[%s4566_s0 + $0x40] sm:$0xff] }
   0x7   :  { %2951 = vmatprep.subr.bf16.mxu1 %v2950_v10  ;;  %v2962_v21 = vpack.c.bf16 %v257_v19, %v256_v18  ;;  %v41_v22 = vld [vmem:[%s4566_s0 + $0x48] sm:$0xff]  ;;  %v258_v23 = vld [vmem:[%s4567_s3 + $0x40] sm:$0xff]  ;;  %v42_v25 = vld [vmem:[%s4566_s0 + $0x50] sm:$0xff] }
   0x8   :  { %2426 = vmatmul.mubr.msk.f32.gmra.mrb[2].mxu0 %vm56_vm0, %v35_v4  ;;  %2953 = vmatpush3.bf16.msra.mxu1 %v2950_v10  ;;  %v259_v24 = vld [vmem:[%s4567_s3 + $0x48] sm:$0xff]  ;;  %v43_v27 = vld [vmem:[%s4566_s0 + $0x58] sm:$0xff]  ;;  %v260_v28 = vld [vmem:[%s4567_s3 + $0x50] sm:$0xff] }
   0x9   :  { %2428 = vmatprep.mubr.msk.f32.mxu0 %vm56_vm0, %v36_v5  ;;  %2955 = vmatprep.subr.bf16.mxu1 %v2954_v11  ;;  %v2966_v26 = vpack.c.bf16 %v259_v24, %v258_v23  ;;  %v261_v29 = vld [vmem:[%s4567_s3 + $0x58] sm:$0xff]  ;;  %v44_v30 = vld [vmem:[%s4566_s0 + $0x60] sm:$0xff]  ;;  %v45_v32 = vld [vmem:[%s4566_s0 + $0x68] sm:$0xff] }
   0xa   :  { %v2970_v31 = vpack.c.bf16 %v261_v29, %v260_v28  ;;  %v262_v33 = vld [vmem:[%s4567_s3 + $0x60] sm:$0xff]  ;;  %v263_v34 = vld [vmem:[%s4567_s3 + $0x68] sm:$0xff]  ;;  %v46_v35 = vld [vmem:[%s4566_s0 + $0x70] sm:$0xff] }
   0xb   :  { %v2974_v36 = vpack.c.bf16 %v263_v34, %v262_v33  ;;  %v47_v37 = vld [vmem:[%s4566_s0 + $0x78] sm:$0xff]  ;;  %v264_v38 = vld [vmem:[%s4567_s3 + $0x70] sm:$0xff]  ;;  %v434_v41 = vld [vmem:[%s4568_s5] sm:$0xff] }
   0xc   :  { %2429 = vmatmul.mubr.msk.f32.gmra.mrb[4].mxu0 %vm56_vm0, %v37_v12  ;;  %2957 = vmatpush3.bf16.msra.mxu1 %v2954_v11  ;;  %v265_v39 = vld [vmem:[%s4567_s3 + $0x78] sm:$0xff]  ;;  %v435_v42 = vld [vmem:[%s4568_s5 + $0x8] sm:$0xff]  ;;  %v436_v43 = vld [vmem:[%s4568_s5 + $0x10] sm:$0xff] }
   0xd   :  { %2431 = vmatprep.mubr.msk.f32.mxu0 %vm56_vm0, %v38_v15  ;;  %2959 = vmatprep.subr.bf16.mxu1 %v2958_v16  ;;  %v2978_v40 = vpack.c.bf16 %v265_v39, %v264_v38  ;;  %v2982_v44 = vpack.c.bf16 %v435_v42, %v434_v41  ;;  %v437_v45 = vld [vmem:[%s4568_s5 + $0x18] sm:$0xff]  ;;  %v438_v47 = vld [vmem:[%s4568_s5 + $0x20] sm:$0xff]  ;;  %v439_v48 = vld [vmem:[%s4568_s5 + $0x28] sm:$0xff] }
   0xe   :  { %v2986_v46 = vpack.c.bf16 %v437_v45, %v436_v43  ;;  %v2990_v49 = vpack.c.bf16 %v439_v48, %v438_v47  ;;  %v440_v50 = vld [vmem:[%s4568_s5 + $0x30] sm:$0xff]  ;;  %v441_v51 = vld [vmem:[%s4568_s5 + $0x38] sm:$0xff]  ;;  %v442_v53 = vld [vmem:[%s4568_s5 + $0x40] sm:$0xff] }
   0xf   :  { %2983 = vmatprep.subr.bf16.mxu0 %v2982_v44  ;;  %v2994_v52 = vpack.c.bf16 %v441_v51, %v440_v50  ;;  %v443_v54 = vld [vmem:[%s4568_s5 + $0x48] sm:$0xff]  ;;  %v1987_v56 = vld [vmem:[%s4569_s2] ss:$0 sm:$0xff]  ;;  %v2009_v38 = vld [vmem:[%s4567_s3 + $0x98] sm:$0xff] }
  0x10   :  { %2432 = vmatmul.mubr.msk.f32.gmra.mrb[6].mxu0 %vm56_vm0, %v39_v17  ;;  %2961 = vmatpush3.bf16.msra.mxu1 %v2958_v16  ;;  %v2998_v55 = vpack.c.bf16 %v443_v54, %v442_v53  ;;  %v446_v28 = vld [vmem:[%s4568_s5 + $0x60] sm:$0xff]  ;;  %v447_v29 = vld [vmem:[%s4568_s5 + $0x68] sm:$0xff]  ;;  %v2012_v43 = vld [vmem:[%s4567_s3 + $0xb0] sm:$0xff] }
  0x11   :  { %2434 = vmatprep.mubr.msk.f32.mxu0 %vm56_vm0, %v40_v20  ;;  %2963 = vmatprep.subr.bf16.mxu1 %v2962_v21  ;;  %v2006_v34 = vld [vmem:[%s4567_s3 + $0x80] sm:$0xff]  ;;  %v2011_v41 = vld [vmem:[%s4567_s3 + $0xa8] sm:$0xff] }
  0x12   :  { %2985 = vmatpush3.bf16.msra.mxu0 %v2982_v44  ;;  %v2013_v44 = vld [vmem:[%s4567_s3 + $0xb8] sm:$0xff] }
  0x13   :  { %2987 = vmatprep.subr.bf16.mxu0 %v2986_v46  ;;  %v3026_v45 = vpack.c.bf16 %v2013_v44, %v2012_v43 }
  0x14   :  { %2435 = vmatmul.mubr.msk.f32.gmra.mrb[8].mxu0 %vm56_vm0, %v41_v22  ;;  %2965 = vmatpush3.bf16.msra.mxu1 %v2962_v21 }
  0x15   :  { %2437 = vmatprep.mubr.msk.f32.mxu0 %vm56_vm0, %v42_v25  ;;  %2967 = vmatprep.subr.bf16.mxu1 %v2966_v26  ;;  %v444_v25 = vld [vmem:[%s4568_s5 + $0x50] sm:$0xff] }
  0x16   :  { %2989 = vmatpush3.bf16.msra.mxu0 %v2986_v46  ;;  %v3801_v46 = vld [vmem:[%s4570_s4] ss:$0 sm:$0xff] }
  0x17   :  { %2991 = vmatprep.subr.bf16.mxu0 %v2990_v49 }
  0x18   :  { %2438 = vmatmul.mubr.msk.f32.gmra.mrb[10].mxu0 %vm56_vm0, %v43_v27  ;;  %2969 = vmatpush3.bf16.msra.mxu1 %v2966_v26  ;;  %v445_v26 = vld [vmem:[%s4568_s5 + $0x58] sm:$0xff] }
  0x19   :  { %2440 = vmatprep.mubr.msk.f32.mxu0 %vm56_vm0, %v44_v30  ;;  %2971 = vmatprep.subr.bf16.mxu1 %v2970_v31  ;;  %v3002_v27 = vpack.c.bf16 %v445_v26, %v444_v25  ;;  %v3006_v30 = vpack.c.bf16 %v447_v29, %v446_v28 }
  0x1a   :  { %2993 = vmatpush3.bf16.msra.mxu0 %v2990_v49 }
  0x1b   :  { %2995 = vmatprep.subr.bf16.mxu0 %v2994_v52 }
  0x1c   :  { %2441 = vmatmul.mubr.msk.f32.gmra.mrb[12].mxu0 %vm56_vm0, %v45_v32  ;;  %2973 = vmatpush3.bf16.msra.mxu1 %v2970_v31  ;;  %v448_v31 = vld [vmem:[%s4568_s5 + $0x70] sm:$0xff]  ;;  %v449_v32 = vld [vmem:[%s4568_s5 + $0x78] sm:$0xff] }
  0x1d   :  { %2443 = vmatprep.mubr.msk.f32.mxu0 %vm56_vm0, %v46_v35  ;;  %2975 = vmatprep.subr.bf16.mxu1 %v2974_v36  ;;  %v3010_v33 = vpack.c.bf16 %v449_v32, %v448_v31  ;;  %v2007_v35 = vld [vmem:[%s4567_s3 + $0x88] sm:$0xff] }
  0x1e   :  { %2997 = vmatpush3.bf16.msra.mxu0 %v2994_v52 }
  0x1f   :  { %2999 = vmatprep.subr.bf16.mxu0 %v2998_v55 }
  0x20   :  { %2444 = vmatmul.mubr.msk.f32.gmra.mrb[14].mxu0 %vm56_vm0, %v47_v37  ;;  %2977 = vmatpush3.bf16.msra.mxu1 %v2974_v36  ;;  %v2008_v36 = vld [vmem:[%s4567_s3 + $0x90] sm:$0xff]  ;;  %v3014_v37 = vpack.c.bf16 %v2007_v35, %v2006_v34 }
  0x21   :  { %2979 = vmatprep.subr.bf16.mxu1 %v2978_v40  ;;  %v3018_v39 = vpack.c.bf16 %v2009_v38, %v2008_v36 }
  0x22   :  { %3001 = vmatpush3.bf16.msra.mxu0 %v2998_v55 }
  0x23   :  { %3003 = vmatprep.subr.bf16.mxu0 %v3002_v27 }
  0x24   :  { %2981 = vmatpush3.bf16.msra.mxu1 %v2978_v40  ;;  %v2010_v40 = vld [vmem:[%s4567_s3 + $0xa0] sm:$0xff] }
  0x25   :  { %3015 = vmatprep.subr.bf16.mxu1 %v3014_v37  ;;  %v3022_v42 = vpack.c.bf16 %v2011_v41, %v2010_v40 }
  0x26   :  { %3005 = vmatpush3.bf16.msra.mxu0 %v3002_v27 }
  0x27   :  { %3007 = vmatprep.subr.bf16.mxu0 %v3006_v30 }
  0x2a   :  { %3009 = vmatpush3.bf16.msra.mxu0 %v3006_v30 }
  0x2b   :  { %3011 = vmatprep.subr.bf16.mxu0 %v3010_v33 }
  0x2e   :  { %3013 = vmatpush3.bf16.msra.mxu0 %v3010_v33 }
  0xd7   :  { %v2424_v57 = vpop.f32.mrb[0].mxu0 }
  0xd8   :  { %v171_v58 = vpop.f32.mrb[1].mxu0  ;;  %v3710_v60 = vadd.f32 %v2424_v57, %v1987_v56 }
  0xd9   :  { %v3708_v59 = vadd.f32 %v1987_v56, %v171_v58 }
  0xdb   :  { %v2427_v61 = vpop.f32.mrb[2].mxu0  ;;  %2478 = vmatprep.mubr.f32.mxu1 %v3708_v59 }
  0xdc   :  { %v181_v62 = vpop.f32.mrb[3].mxu0  ;;  %2479 = vmatmul.mubr.f32.vlgmr.msra.gmra.mrb[0].mxu1 %v3710_v60  ;;  %v3716_v0 = vadd.f32 %v2427_v61, %v1987_v56 }
  0xdd   :  { %v3714_v63 = vadd.f32 %v1987_v56, %v181_v62  ;;  %3017 = vmatpush3.bf16.msra.mxu1 %v3014_v37 }
  0xde   :  { %3019 = vmatprep.subr.bf16.mxu1 %v3018_v39 }
  0xdf   :  { %v2430_v1 = vpop.f32.mrb[4].mxu0  ;;  %2481 = vmatprep.mubr.f32.mxu1 %v3714_v63 }
  0xe0   :  { %v191_v2 = vpop.f32.mrb[5].mxu0  ;;  %2482 = vmatmul.mubr.f32.gmra.mrb[2].mxu1 %v3716_v0  ;;  %v3722_v4 = vadd.f32 %v2430_v1, %v1987_v56 }
  0xe1   :  { %v3720_v3 = vadd.f32 %v1987_v56, %v191_v2  ;;  %3021 = vmatpush3.bf16.msra.mxu1 %v3018_v39 }
  0xe2   :  { %3023 = vmatprep.subr.bf16.mxu1 %v3022_v42 }
  0xe3   :  { %v2433_v5 = vpop.f32.mrb[6].mxu0  ;;  %2484 = vmatprep.mubr.f32.mxu1 %v3720_v3 }
  0xe4   :  { %v201_v6 = vpop.f32.mrb[7].mxu0  ;;  %2485 = vmatmul.mubr.f32.gmra.mrb[4].mxu1 %v3722_v4  ;;  %v3728_v8 = vadd.f32 %v2433_v5, %v1987_v56 }
  0xe5   :  { %v3726_v7 = vadd.f32 %v1987_v56, %v201_v6  ;;  %3025 = vmatpush3.bf16.msra.mxu1 %v3022_v42 }
  0xe6   :  { %3027 = vmatprep.subr.bf16.mxu1 %v3026_v45 }
  0xe7   :  { %v2436_v9 = vpop.f32.mrb[8].mxu0  ;;  %2487 = vmatprep.mubr.f32.mxu1 %v3726_v7 }
  0xe8   :  { %v211_v10 = vpop.f32.mrb[9].mxu0  ;;  %2488 = vmatmul.mubr.f32.gmra.mrb[6].mxu1 %v3728_v8  ;;  %v3734_v12 = vadd.f32 %v2436_v9, %v1987_v56 }
  0xe9   :  { %v3732_v11 = vadd.f32 %v1987_v56, %v211_v10  ;;  %3029 = vmatpush3.bf16.msra.mxu1 %v3026_v45 }
  0xeb   :  { %v2439_v13 = vpop.f32.mrb[10].mxu0  ;;  %2490 = vmatprep.mubr.f32.mxu1 %v3732_v11 }
  0xec   :  { %v221_v14 = vpop.f32.mrb[11].mxu0  ;;  %2491 = vmatmul.mubr.f32.gmra.mrb[8].mxu1 %v3734_v12  ;;  %v3740_v16 = vadd.f32 %v2439_v13, %v1987_v56 }
  0xed   :  { %v3738_v15 = vadd.f32 %v1987_v56, %v221_v14 }
  0xef   :  { %v2442_v17 = vpop.f32.mrb[12].mxu0  ;;  %2493 = vmatprep.mubr.f32.mxu1 %v3738_v15 }
  0xf0   :  { %v231_v18 = vpop.f32.mrb[13].mxu0  ;;  %2494 = vmatmul.mubr.f32.gmra.mrb[10].mxu1 %v3740_v16  ;;  %v3746_v20 = vadd.f32 %v2442_v17, %v1987_v56 }
  0xf1   :  { %v3744_v19 = vadd.f32 %v1987_v56, %v231_v18 }
  0xf3   :  { %v2445_v21 = vpop.f32.mrb[14].mxu0  ;;  %2496 = vmatprep.mubr.f32.mxu1 %v3744_v19 }
  0xf4   :  { %v241_v22 = vpop.f32.mrb[15].mxu0  ;;  %2497 = vmatmul.mubr.f32.gmra.mrb[12].mxu1 %v3746_v20  ;;  %v3752_v24 = vadd.f32 %v2445_v21, %v1987_v56 }
  0xf5   :  { %v3750_v23 = vadd.f32 %v1987_v56, %v241_v22 }
  0xf7   :  { %2499 = vmatprep.mubr.f32.mxu1 %v3750_v23 }
  0xf8   :  { %2500 = vmatmul.mubr.f32.gmra.mrb[14].mxu1 %v3752_v24 }
 0x1af   :  { %v2480_v47 = vpop.f32.mrb[0].mxu1 }
 0x1b0   :  { %v345_v48 = vadd.f32 %v2480_v47, %v3801_v46  ;;  %v339_v49 = vpop.f32.mrb[1].mxu1 }
 0x1b1   :  { %v340_v50 = vadd.f32 %v3801_v46, %v339_v49 }
 0x1b3   :  { %3254 = vtanh.f32 %v340_v50  ;;  %v2483_v51 = vpop.f32.mrb[2].mxu1  ;;  %v2016_v50 = vld [vmem:[%s4567_s3 + $0xd0] sm:$0xff] }
 0x1b4   :  { %3256 = vtanh.f32 %v345_v48  ;;  %v355_v52 = vadd.f32 %v2483_v51, %v3801_v46  ;;  %v349_v53 = vpop.f32.mrb[3].mxu1  ;;  %v2015_v48 = vld [vmem:[%s4567_s3 + $0xc8] sm:$0xff]  ;;  %v2017_v51 = vld [vmem:[%s4567_s3 + $0xd8] sm:$0xff] }
 0x1b5   :  { %v350_v54 = vadd.f32 %v3801_v46, %v349_v53  ;;  %v2018_v53 = vld [vmem:[%s4567_s3 + $0xe0] sm:$0xff] }
 0x1b7   :  { %3258 = vtanh.f32 %v350_v54  ;;  %v2486_v55 = vpop.f32.mrb[4].mxu1  ;;  %v2019_v54 = vld [vmem:[%s4567_s3 + $0xe8] sm:$0xff] }
 0x1b8   :  { %3260 = vtanh.f32 %v355_v52  ;;  %v365_v56 = vadd.f32 %v2486_v55, %v3801_v46  ;;  %v359_v57 = vpop.f32.mrb[5].mxu1  ;;  %v3034_v52 = vpack.c.bf16 %v2017_v51, %v2016_v50  ;;  %v3038_v55 = vpack.c.bf16 %v2019_v54, %v2018_v53 }
 0x1b9   :  { %v360_v58 = vadd.f32 %v3801_v46, %v359_v57  ;;  %v2021_v57 = vld [vmem:[%s4567_s3 + $0xf8] sm:$0xff] }
 0x1bb   :  { %3262 = vtanh.f32 %v360_v58  ;;  %v2489_v61 = vpop.f32.mrb[6].mxu1 }
 0x1bc   :  { %3264 = vtanh.f32 %v365_v56  ;;  %v375_v62 = vadd.f32 %v2489_v61, %v3801_v46  ;;  %v369_v1 = vpop.f32.mrb[7].mxu1  ;;  %v2020_v56 = vld [vmem:[%s4567_s3 + $0xf0] sm:$0xff]  ;;  %v2024_v61 = vld [vmem:[%s4568_s5 + $0x80] sm:$0xff] }
 0x1bd   :  { %v3255_v2 = vpop.eup %3254  ;;  %v370_v5 = vadd.f32 %v3801_v46, %v369_v1  ;;  %v3042_v58 = vpack.c.bf16 %v2021_v57, %v2020_v56  ;;  %v2026_v1 = vld [vmem:[%s4568_s5 + $0x90] sm:$0xff] }
 0x1be   :  { %v3257_v6 = vpop.eup %3256  ;;  %2534 = vmatprep.mubr.f32.mxu0 %v3255_v2 }
 0x1bf   :  { %3266 = vtanh.f32 %v370_v5  ;;  %v2492_v9 = vpop.f32.mrb[8].mxu1  ;;  %2535 = vmatmul.mubr.f32.vlgmr.msra.gmra.mrb[16].mxu0 %v3257_v6  ;;  %v2027_v5 = vld [vmem:[%s4568_s5 + $0x98] sm:$0xff] }
 0x1c0   :  { %3268 = vtanh.f32 %v375_v62  ;;  %v385_v10 = vadd.f32 %v2492_v9, %v3801_v46  ;;  %v379_v13 = vpop.f32.mrb[9].mxu1  ;;  %v2025_v62 = vld [vmem:[%s4568_s5 + $0x88] sm:$0xff]  ;;  %v3050_v6 = vpack.c.bf16 %v2027_v5, %v2026_v1  ;;  %v2028_v9 = vld [vmem:[%s4568_s5 + $0xa0] sm:$0xff] }
 0x1c1   :  { %v3259_v14 = vpop.eup %3258  ;;  %v380_v17 = vadd.f32 %v3801_v46, %v379_v13  ;;  %v3046_v2 = vpack.c.bf16 %v2025_v62, %v2024_v61 }
 0x1c2   :  { %v3261_v18 = vpop.eup %3260  ;;  %2537 = vmatprep.mubr.f32.mxu0 %v3259_v14  ;;  %v2030_v14 = vld [vmem:[%s4568_s5 + $0xb0] sm:$0xff] }
 0x1c3   :  { %3270 = vtanh.f32 %v380_v17  ;;  %v2495_v21 = vpop.f32.mrb[10].mxu1  ;;  %2538 = vmatmul.mubr.f32.gmra.mrb[18].mxu0 %v3261_v18  ;;  %3047 = vmatprep.subr.bf16.mxu0 %v3046_v2  ;;  %v2031_v17 = vld [vmem:[%s4568_s5 + $0xb8] sm:$0xff] }
 0x1c4   :  { %3272 = vtanh.f32 %v385_v10  ;;  %v395_v22 = vadd.f32 %v2495_v21, %v3801_v46  ;;  %v389_v25 = vpop.f32.mrb[11].mxu1  ;;  %v2029_v10 = vld [vmem:[%s4568_s5 + $0xa8] sm:$0xff]  ;;  %3049 = vmatpush3.bf16.msra.mxu0 %v3046_v2  ;;  %v3058_v18 = vpack.c.bf16 %v2031_v17, %v2030_v14  ;;  %v2032_v21 = vld [vmem:[%s4568_s5 + $0xc0] sm:$0xff] }
 0x1c5   :  { %v3263_v26 = vpop.eup %3262  ;;  %v390_v27 = vadd.f32 %v3801_v46, %v389_v25  ;;  %3051 = vmatprep.subr.bf16.mxu0 %v3050_v6  ;;  %v3054_v13 = vpack.c.bf16 %v2029_v10, %v2028_v9 }
 0x1c6   :  { %v3265_v28 = vpop.eup %3264  ;;  %2540 = vmatprep.mubr.f32.mxu0 %v3263_v26  ;;  %v3876_v26 = vld [vmem:[%s4571_s6] ss:$0 sm:$0xff] }
 0x1c7   :  { %3274 = vtanh.f32 %v390_v27  ;;  %v2498_v29 = vpop.f32.mrb[12].mxu1  ;;  %2541 = vmatmul.mubr.f32.gmra.mrb[20].mxu0 %v3265_v28 }
 0x1c8   :  { %3276 = vtanh.f32 %v395_v22  ;;  %v405_v30 = vadd.f32 %v2498_v29, %v3801_v46  ;;  %v399_v31 = vpop.f32.mrb[13].mxu1  ;;  %3053 = vmatpush3.bf16.msra.mxu0 %v3050_v6  ;;  %v2033_v22 = vld [vmem:[%s4568_s5 + $0xc8] sm:$0xff] }
 0x1c9   :  { %v3267_v32 = vpop.eup %3266  ;;  %v400_v33 = vadd.f32 %v3801_v46, %v399_v31  ;;  %3055 = vmatprep.subr.bf16.mxu0 %v3054_v13  ;;  %v3062_v25 = vpack.c.bf16 %v2033_v22, %v2032_v21 }
 0x1ca   :  { %v3269_v34 = vpop.eup %3268  ;;  %2543 = vmatprep.mubr.f32.mxu0 %v3267_v32 }
 0x1cb   :  { %3278 = vtanh.f32 %v400_v33  ;;  %v2501_v35 = vpop.f32.mrb[14].mxu1  ;;  %2544 = vmatmul.mubr.f32.gmra.mrb[22].mxu0 %v3269_v34 }
 0x1cc   :  { %3280 = vtanh.f32 %v405_v30  ;;  %v415_v36 = vadd.f32 %v2501_v35, %v3801_v46  ;;  %v409_v37 = vpop.f32.mrb[15].mxu1  ;;  %3057 = vmatpush3.bf16.msra.mxu0 %v3054_v13 }
 0x1cd   :  { %v3271_v38 = vpop.eup %3270  ;;  %v410_v39 = vadd.f32 %v3801_v46, %v409_v37  ;;  %v2014_v46 = vld [vmem:[%s4567_s3 + $0xc0] sm:$0xff]  ;;  %3059 = vmatprep.subr.bf16.mxu0 %v3058_v18 }
 0x1ce   :  { %v3273_v40 = vpop.eup %3272  ;;  %2546 = vmatprep.mubr.f32.mxu0 %v3271_v38  ;;  %v3030_v49 = vpack.c.bf16 %v2015_v48, %v2014_v46 }
 0x1cf   :  { %3282 = vtanh.f32 %v410_v39  ;;  %2547 = vmatmul.mubr.f32.gmra.mrb[24].mxu0 %v3273_v40 }
 0x1d0   :  { %3284 = vtanh.f32 %v415_v36  ;;  %3031 = vmatprep.subr.bf16.mxu1 %v3030_v49  ;;  %3061 = vmatpush3.bf16.msra.mxu0 %v3058_v18 }
 0x1d1   :  { %v3275_v41 = vpop.eup %3274  ;;  %3033 = vmatpush3.bf16.msra.mxu1 %v3030_v49  ;;  %3063 = vmatprep.subr.bf16.mxu0 %v3062_v25 }
 0x1d2   :  { %v3277_v42 = vpop.eup %3276  ;;  %2549 = vmatprep.mubr.f32.mxu0 %v3275_v41  ;;  %3035 = vmatprep.subr.bf16.mxu1 %v3034_v52 }
 0x1d3   :  { %2550 = vmatmul.mubr.f32.gmra.mrb[26].mxu0 %v3277_v42 }
 0x1d4   :  { %3065 = vmatpush3.bf16.msra.mxu0 %v3062_v25 }
 0x1d5   :  { %v3279_v43 = vpop.eup %3278  ;;  %3037 = vmatpush3.bf16.msra.mxu1 %v3034_v52 }
 0x1d6   :  { %v3281_v44 = vpop.eup %3280  ;;  %2552 = vmatprep.mubr.f32.mxu0 %v3279_v43  ;;  %3039 = vmatprep.subr.bf16.mxu1 %v3038_v55 }
 0x1d7   :  { %2553 = vmatmul.mubr.f32.gmra.mrb[28].mxu0 %v3281_v44 }
 0x1d9   :  { %v3283_v45 = vpop.eup %3282  ;;  %3041 = vmatpush3.bf16.msra.mxu1 %v3038_v55 }
 0x1da   :  { %v3285_v47 = vpop.eup %3284  ;;  %2555 = vmatprep.mubr.f32.mxu0 %v3283_v45  ;;  %3043 = vmatprep.subr.bf16.mxu1 %v3042_v58 }
 0x1db   :  { %2556 = vmatmul.mubr.f32.gmra.mrb[30].mxu0 %v3285_v47 }
 0x1dd   :  { %3045 = vmatpush3.bf16.msra.mxu1 %v3042_v58 }
 0x292   :  { %v2536_v27 = vpop.f32.mrb[16].mxu0 }
 0x293   :  { %v529_v28 = vadd.f32 %v2536_v27, %v3876_v26  ;;  %v523_v29 = vpop.f32.mrb[17].mxu0 }
 0x294   :  { %v524_v30 = vadd.f32 %v3876_v26, %v523_v29 }
 0x295   :  { %3286 = vtanh.f32 %v529_v28 }
 0x296   :  { %3288 = vtanh.f32 %v524_v30  ;;  %v2539_v31 = vpop.f32.mrb[18].mxu0 }
 0x297   :  { %v539_v32 = vadd.f32 %v2539_v31, %v3876_v26  ;;  %v533_v33 = vpop.f32.mrb[19].mxu0 }
 0x298   :  { %v534_v34 = vadd.f32 %v3876_v26, %v533_v33  ;;  %v2038_v33 = vld [vmem:[%s4568_s5 + $0xf0] sm:$0xff] }
 0x299   :  { %3290 = vtanh.f32 %v539_v32 }
 0x29a   :  { %3292 = vtanh.f32 %v534_v34  ;;  %v2542_v35 = vpop.f32.mrb[20].mxu0  ;;  %v2039_v34 = vld [vmem:[%s4568_s5 + $0xf8] sm:$0xff] }
 0x29b   :  { %v549_v36 = vadd.f32 %v2542_v35, %v3876_v26  ;;  %v543_v37 = vpop.f32.mrb[21].mxu0  ;;  %v3074_v35 = vpack.c.bf16 %v2039_v34, %v2038_v33 }
 0x29c   :  { %v544_v38 = vadd.f32 %v3876_v26, %v543_v37  ;;  %v2043_v37 = vld [vmem:[%s4567_s3 + $0x108] sm:$0xff] }
 0x29d   :  { %3294 = vtanh.f32 %v549_v36  ;;  %v2042_v36 = vld [vmem:[%s4567_s3 + $0x100] sm:$0xff] }
 0x29e   :  { %3296 = vtanh.f32 %v544_v38  ;;  %v2545_v39 = vpop.f32.mrb[22].mxu0  ;;  %v2044_v38 = vld [vmem:[%s4567_s3 + $0x110] sm:$0xff] }
 0x29f   :  { %v3287_v40 = vpop.eup %3286  ;;  %v559_v41 = vadd.f32 %v2545_v39, %v3876_v26  ;;  %v553_v42 = vpop.f32.mrb[23].mxu0  ;;  %v3078_v39 = vpack.c.bf16 %v2043_v37, %v2042_v36 }
 0x2a0   :  { %v3289_v43 = vpop.eup %3288  ;;  %v554_v44 = vadd.f32 %v3876_v26, %v553_v42  ;;  %v3890_v46 = vadd.f32 %v3287_v40, %v3710_v60  ;;  %v2045_v40 = vld [vmem:[%s4567_s3 + $0x118] sm:$0xff]  ;;  %v2046_v42 = vld [vmem:[%s4567_s3 + $0x120] sm:$0xff] }
 0x2a1   :  { %3298 = vtanh.f32 %v559_v41  ;;  %v3887_v45 = vadd.f32 %v3289_v43, %v3708_v59  ;;  %v3082_v41 = vpack.c.bf16 %v2045_v40, %v2044_v38  ;;  %v2047_v43 = vld [vmem:[%s4567_s3 + $0x128] sm:$0xff]  ;;  %3079 = vmatprep.subr.bf16.mxu1 %v3078_v39 }
 0x2a2   :  { %3300 = vtanh.f32 %v554_v44  ;;  %v2548_v47 = vpop.f32.mrb[24].mxu0  ;;  %v3086_v44 = vpack.c.bf16 %v2047_v43, %v2046_v42 }
 0x2a3   :  { %v3291_v48 = vpop.eup %3290  ;;  %v569_v49 = vadd.f32 %v2548_v47, %v3876_v26  ;;  %v563_v50 = vpop.f32.mrb[25].mxu0  ;;  %2590 = vmatprep.mubr.f32.mxu1 %v3887_v45  ;;  %v2048_v47 = vld [vmem:[%s4567_s3 + $0x130] sm:$0xff] }
 0x2a4   :  { %v3293_v51 = vpop.eup %3292  ;;  %v564_v52 = vadd.f32 %v3876_v26, %v563_v50  ;;  %2591 = vmatmul.mubr.f32.vlgmr.msra.gmra.mrb[16].mxu1 %v3890_v46  ;;  %v3900_v60 = vadd.f32 %v3291_v48, %v3716_v0  ;;  %v2049_v48 = vld [vmem:[%s4567_s3 + $0x138] sm:$0xff]  ;;  %v4003_v50 = vld [vmem:[%s4570_s4 + $0x1] ss:$0 sm:$0xff] }
 0x2a5   :  { %3302 = vtanh.f32 %v569_v49  ;;  %v3897_v59 = vadd.f32 %v3293_v51, %v3714_v63  ;;  %3081 = vmatpush3.bf16.msra.mxu1 %v3078_v39  ;;  %v3090_v49 = vpack.c.bf16 %v2049_v48, %v2048_v47 }
 0x2a6   :  { %3304 = vtanh.f32 %v564_v52  ;;  %v2551_v53 = vpop.f32.mrb[26].mxu0  ;;  %3083 = vmatprep.subr.bf16.mxu1 %v3082_v41 }
 0x2a7   :  { %v3295_v54 = vpop.eup %3294  ;;  %v579_v55 = vadd.f32 %v2551_v53, %v3876_v26  ;;  %v573_v56 = vpop.f32.mrb[27].mxu0  ;;  %2593 = vmatprep.mubr.f32.mxu1 %v3897_v59 }
 0x2a8   :  { %v3297_v57 = vpop.eup %3296  ;;  %v574_v58 = vadd.f32 %v3876_v26, %v573_v56  ;;  %2594 = vmatmul.mubr.f32.gmra.mrb[18].mxu1 %v3900_v60  ;;  %v3910_v0 = vadd.f32 %v3295_v54, %v3722_v4 }
 0x2a9   :  { %3306 = vtanh.f32 %v579_v55  ;;  %v3907_v63 = vadd.f32 %v3297_v57, %v3720_v3  ;;  %3085 = vmatpush3.bf16.msra.mxu1 %v3082_v41 }
 0x2aa   :  { %3308 = vtanh.f32 %v574_v58  ;;  %v2554_v61 = vpop.f32.mrb[28].mxu0  ;;  %3087 = vmatprep.subr.bf16.mxu1 %v3086_v44 }
 0x2ab   :  { %v3299_v62 = vpop.eup %3298  ;;  %v589_v1 = vadd.f32 %v2554_v61, %v3876_v26  ;;  %v583_v2 = vpop.f32.mrb[29].mxu0  ;;  %2596 = vmatprep.mubr.f32.mxu1 %v3907_v63 }
 0x2ac   :  { %v3301_v5 = vpop.eup %3300  ;;  %v584_v6 = vadd.f32 %v3876_v26, %v583_v2  ;;  %2597 = vmatmul.mubr.f32.gmra.mrb[20].mxu1 %v3910_v0  ;;  %v3920_v4 = vadd.f32 %v3299_v62, %v3728_v8 }
 0x2ad   :  { %3310 = vtanh.f32 %v589_v1  ;;  %v3917_v3 = vadd.f32 %v3301_v5, %v3726_v7  ;;  %3089 = vmatpush3.bf16.msra.mxu1 %v3086_v44 }
 0x2ae   :  { %3312 = vtanh.f32 %v584_v6  ;;  %v2557_v9 = vpop.f32.mrb[30].mxu0  ;;  %3091 = vmatprep.subr.bf16.mxu1 %v3090_v49 }
 0x2af   :  { %v3303_v10 = vpop.eup %3302  ;;  %v599_v13 = vadd.f32 %v2557_v9, %v3876_v26  ;;  %v593_v14 = vpop.f32.mrb[31].mxu0  ;;  %2599 = vmatprep.mubr.f32.mxu1 %v3917_v3 }
 0x2b0   :  { %v3305_v17 = vpop.eup %3304  ;;  %v594_v18 = vadd.f32 %v3876_v26, %v593_v14  ;;  %2600 = vmatmul.mubr.f32.gmra.mrb[22].mxu1 %v3920_v4  ;;  %v3930_v21 = vadd.f32 %v3303_v10, %v3734_v12 }
 0x2b1   :  { %3314 = vtanh.f32 %v599_v13  ;;  %v3927_v7 = vadd.f32 %v3305_v17, %v3732_v11  ;;  %3093 = vmatpush3.bf16.msra.mxu1 %v3090_v49 }
 0x2b2   :  { %3316 = vtanh.f32 %v594_v18 }
 0x2b3   :  { %v3307_v8 = vpop.eup %3306  ;;  %2602 = vmatprep.mubr.f32.mxu1 %v3927_v7 }
 0x2b4   :  { %v3309_v22 = vpop.eup %3308  ;;  %2603 = vmatmul.mubr.f32.gmra.mrb[24].mxu1 %v3930_v21  ;;  %v3938_v26 = vadd.f32 %v3307_v8, %v3740_v16 }
 0x2b5   :  { %v3935_v25 = vadd.f32 %v3309_v22, %v3738_v15 }
 0x2b7   :  { %v3311_v27 = vpop.eup %3310  ;;  %2605 = vmatprep.mubr.f32.mxu1 %v3935_v25 }
 0x2b8   :  { %v3313_v11 = vpop.eup %3312  ;;  %2606 = vmatmul.mubr.f32.gmra.mrb[26].mxu1 %v3938_v26  ;;  %v3946_v28 = vadd.f32 %v3311_v27, %v3746_v20  ;;  %v2035_v20 = vld [vmem:[%s4568_s5 + $0xd8] sm:$0xff] }
 0x2b9   :  { %v3943_v12 = vadd.f32 %v3313_v11, %v3744_v19  ;;  %v2034_v19 = vld [vmem:[%s4568_s5 + $0xd0] sm:$0xff] }
 0x2ba   :  { %v3066_v31 = vpack.c.bf16 %v2035_v20, %v2034_v19 }
 0x2bb   :  { %v3315_v29 = vpop.eup %3314  ;;  %2608 = vmatprep.mubr.f32.mxu1 %v3943_v12 }
 0x2bc   :  { %v3317_v15 = vpop.eup %3316  ;;  %2609 = vmatmul.mubr.f32.gmra.mrb[28].mxu1 %v3946_v28  ;;  %v3954_v30 = vadd.f32 %v3315_v29, %v3752_v24  ;;  %3067 = vmatprep.subr.bf16.mxu0 %v3066_v31  ;;  %v2037_v24 = vld [vmem:[%s4568_s5 + $0xe8] sm:$0xff] }
 0x2bd   :  { %v3951_v16 = vadd.f32 %v3317_v15, %v3750_v23  ;;  %3069 = vmatpush3.bf16.msra.mxu0 %v3066_v31  ;;  %v2036_v23 = vld [vmem:[%s4568_s5 + $0xe0] sm:$0xff] }
 0x2be   :  { %v3070_v32 = vpack.c.bf16 %v2037_v24, %v2036_v23 }
 0x2bf   :  { %2611 = vmatprep.mubr.f32.mxu1 %v3951_v16 }
 0x2c0   :  { %2612 = vmatmul.mubr.f32.gmra.mrb[30].mxu1 %v3954_v30  ;;  %3071 = vmatprep.subr.bf16.mxu0 %v3070_v32 }
 0x2c1   :  { %3073 = vmatpush3.bf16.msra.mxu0 %v3070_v32 }
 0x2c2   :  { %3075 = vmatprep.subr.bf16.mxu0 %v3074_v35 }
 0x2c5   :  { %3077 = vmatpush3.bf16.msra.mxu0 %v3074_v35 }
 0x377   :  { %v2592_v51 = vpop.f32.mrb[16].mxu1 }
 0x378   :  { %v731_v52 = vadd.f32 %v2592_v51, %v4003_v50  ;;  %v725_v53 = vpop.f32.mrb[17].mxu1 }
 0x379   :  { %v726_v54 = vadd.f32 %v4003_v50, %v725_v53 }
 0x37b   :  { %3318 = vtanh.f32 %v726_v54  ;;  %v2595_v55 = vpop.f32.mrb[18].mxu1  ;;  %v2052_v54 = vld [vmem:[%s4567_s3 + $0x150] sm:$0xff] }
 0x37c   :  { %3320 = vtanh.f32 %v731_v52  ;;  %v741_v56 = vadd.f32 %v2595_v55, %v4003_v50  ;;  %v735_v57 = vpop.f32.mrb[19].mxu1  ;;  %v2051_v52 = vld [vmem:[%s4567_s3 + $0x148] sm:$0xff]  ;;  %v2053_v55 = vld [vmem:[%s4567_s3 + $0x158] sm:$0xff] }
 0x37d   :  { %v736_v58 = vadd.f32 %v4003_v50, %v735_v57  ;;  %v2054_v57 = vld [vmem:[%s4567_s3 + $0x160] sm:$0xff] }
 0x37f   :  { %3322 = vtanh.f32 %v736_v58  ;;  %v2598_v61 = vpop.f32.mrb[20].mxu1  ;;  %v2055_v58 = vld [vmem:[%s4567_s3 + $0x168] sm:$0xff] }
 0x380   :  { %3324 = vtanh.f32 %v741_v56  ;;  %v751_v62 = vadd.f32 %v2598_v61, %v4003_v50  ;;  %v745_v1 = vpop.f32.mrb[21].mxu1  ;;  %v3098_v56 = vpack.c.bf16 %v2053_v55, %v2052_v54  ;;  %v3102_v61 = vpack.c.bf16 %v2055_v58, %v2054_v57 }
 0x381   :  { %v746_v2 = vadd.f32 %v4003_v50, %v745_v1  ;;  %v2057_v1 = vld [vmem:[%s4567_s3 + $0x178] sm:$0xff] }
 0x383   :  { %3326 = vtanh.f32 %v746_v2  ;;  %v2601_v5 = vpop.f32.mrb[22].mxu1 }
 0x384   :  { %3328 = vtanh.f32 %v751_v62  ;;  %v761_v6 = vadd.f32 %v2601_v5, %v4003_v50  ;;  %v755_v9 = vpop.f32.mrb[23].mxu1  ;;  %v2056_v62 = vld [vmem:[%s4567_s3 + $0x170] sm:$0xff]  ;;  %v2060_v5 = vld [vmem:[%s4568_s5 + $0x100] sm:$0xff] }
 0x385   :  { %v3319_v10 = vpop.eup %3318  ;;  %v756_v13 = vadd.f32 %v4003_v50, %v755_v9  ;;  %v3106_v2 = vpack.c.bf16 %v2057_v1, %v2056_v62  ;;  %v2062_v9 = vld [vmem:[%s4568_s5 + $0x110] sm:$0xff] }
 0x386   :  { %v3321_v14 = vpop.eup %3320  ;;  %2646 = vmatprep.mubr.f32.mxu0 %v3319_v10 }
 0x387   :  { %3330 = vtanh.f32 %v756_v13  ;;  %v2604_v17 = vpop.f32.mrb[24].mxu1  ;;  %2647 = vmatmul.mubr.f32.vlgmr.msra.gmra.mrb[32].mxu0 %v3321_v14  ;;  %v2063_v13 = vld [vmem:[%s4568_s5 + $0x118] sm:$0xff] }
 0x388   :  { %3332 = vtanh.f32 %v761_v6  ;;  %v771_v18 = vadd.f32 %v2604_v17, %v4003_v50  ;;  %v765_v8 = vpop.f32.mrb[25].mxu1  ;;  %v2061_v6 = vld [vmem:[%s4568_s5 + $0x108] sm:$0xff]  ;;  %v3114_v14 = vpack.c.bf16 %v2063_v13, %v2062_v9  ;;  %v2064_v17 = vld [vmem:[%s4568_s5 + $0x120] sm:$0xff] }
 0x389   :  { %v3323_v22 = vpop.eup %3322  ;;  %v766_v27 = vadd.f32 %v4003_v50, %v765_v8  ;;  %v3110_v10 = vpack.c.bf16 %v2061_v6, %v2060_v5 }
 0x38a   :  { %v3325_v11 = vpop.eup %3324  ;;  %2649 = vmatprep.mubr.f32.mxu0 %v3323_v22  ;;  %v2066_v22 = vld [vmem:[%s4568_s5 + $0x130] sm:$0xff] }
 0x38b   :  { %3334 = vtanh.f32 %v766_v27  ;;  %v2607_v29 = vpop.f32.mrb[26].mxu1  ;;  %2650 = vmatmul.mubr.f32.gmra.mrb[34].mxu0 %v3325_v11  ;;  %3111 = vmatprep.subr.bf16.mxu0 %v3110_v10  ;;  %v2067_v27 = vld [vmem:[%s4568_s5 + $0x138] sm:$0xff] }
 0x38c   :  { %3336 = vtanh.f32 %v771_v18  ;;  %v781_v15 = vadd.f32 %v2607_v29, %v4003_v50  ;;  %v775_v19 = vpop.f32.mrb[27].mxu1  ;;  %v2065_v18 = vld [vmem:[%s4568_s5 + $0x128] sm:$0xff]  ;;  %3113 = vmatpush3.bf16.msra.mxu0 %v3110_v10  ;;  %v3122_v11 = vpack.c.bf16 %v2067_v27, %v2066_v22  ;;  %v2068_v29 = vld [vmem:[%s4568_s5 + $0x140] sm:$0xff] }
 0x38d   :  { %v3327_v20 = vpop.eup %3326  ;;  %v776_v31 = vadd.f32 %v4003_v50, %v775_v19  ;;  %3115 = vmatprep.subr.bf16.mxu0 %v3114_v14  ;;  %v3118_v8 = vpack.c.bf16 %v2065_v18, %v2064_v17 }
 0x38e   :  { %v3329_v23 = vpop.eup %3328  ;;  %2652 = vmatprep.mubr.f32.mxu0 %v3327_v20  ;;  %v4078_v20 = vld [vmem:[%s4571_s6 + $0x1] ss:$0 sm:$0xff] }
 0x38f   :  { %3338 = vtanh.f32 %v776_v31  ;;  %v2610_v24 = vpop.f32.mrb[28].mxu1  ;;  %2653 = vmatmul.mubr.f32.gmra.mrb[36].mxu0 %v3329_v23 }
 0x390   :  { %3340 = vtanh.f32 %v781_v15  ;;  %v791_v32 = vadd.f32 %v2610_v24, %v4003_v50  ;;  %v785_v33 = vpop.f32.mrb[29].mxu1  ;;  %3117 = vmatpush3.bf16.msra.mxu0 %v3114_v14  ;;  %v2069_v15 = vld [vmem:[%s4568_s5 + $0x148] sm:$0xff] }
 0x391   :  { %v3331_v34 = vpop.eup %3330  ;;  %v786_v35 = vadd.f32 %v4003_v50, %v785_v33  ;;  %3119 = vmatprep.subr.bf16.mxu0 %v3118_v8  ;;  %v3126_v19 = vpack.c.bf16 %v2069_v15, %v2068_v29 }
 0x392   :  { %v3333_v36 = vpop.eup %3332  ;;  %2655 = vmatprep.mubr.f32.mxu0 %v3331_v34 }
 0x393   :  { %3342 = vtanh.f32 %v786_v35  ;;  %v2613_v37 = vpop.f32.mrb[30].mxu1  ;;  %2656 = vmatmul.mubr.f32.gmra.mrb[38].mxu0 %v3333_v36 }
 0x394   :  { %3344 = vtanh.f32 %v791_v32  ;;  %v801_v38 = vadd.f32 %v2613_v37, %v4003_v50  ;;  %v795_v39 = vpop.f32.mrb[31].mxu1  ;;  %3121 = vmatpush3.bf16.msra.mxu0 %v3118_v8 }
 0x395   :  { %v3335_v40 = vpop.eup %3334  ;;  %v796_v41 = vadd.f32 %v4003_v50, %v795_v39  ;;  %v2050_v50 = vld [vmem:[%s4567_s3 + $0x140] sm:$0xff]  ;;  %3123 = vmatprep.subr.bf16.mxu0 %v3122_v11 }
 0x396   :  { %v3337_v42 = vpop.eup %3336  ;;  %2658 = vmatprep.mubr.f32.mxu0 %v3335_v40  ;;  %v3094_v53 = vpack.c.bf16 %v2051_v52, %v2050_v50 }
 0x397   :  { %3346 = vtanh.f32 %v796_v41  ;;  %2659 = vmatmul.mubr.f32.gmra.mrb[40].mxu0 %v3337_v42 }
 0x398   :  { %3348 = vtanh.f32 %v801_v38  ;;  %3095 = vmatprep.subr.bf16.mxu1 %v3094_v53  ;;  %3125 = vmatpush3.bf16.msra.mxu0 %v3122_v11 }
 0x399   :  { %v3339_v43 = vpop.eup %3338  ;;  %3097 = vmatpush3.bf16.msra.mxu1 %v3094_v53  ;;  %3127 = vmatprep.subr.bf16.mxu0 %v3126_v19 }
 0x39a   :  { %v3341_v44 = vpop.eup %3340  ;;  %2661 = vmatprep.mubr.f32.mxu0 %v3339_v43  ;;  %3099 = vmatprep.subr.bf16.mxu1 %v3098_v56 }
 0x39b   :  { %2662 = vmatmul.mubr.f32.gmra.mrb[42].mxu0 %v3341_v44 }
 0x39c   :  { %3129 = vmatpush3.bf16.msra.mxu0 %v3126_v19 }
 0x39d   :  { %v3343_v47 = vpop.eup %3342  ;;  %3101 = vmatpush3.bf16.msra.mxu1 %v3098_v56 }
 0x39e   :  { %v3345_v48 = vpop.eup %3344  ;;  %2664 = vmatprep.mubr.f32.mxu0 %v3343_v47  ;;  %3103 = vmatprep.subr.bf16.mxu1 %v3102_v61 }
 0x39f   :  { %2665 = vmatmul.mubr.f32.gmra.mrb[44].mxu0 %v3345_v48 }
 0x3a1   :  { %v3347_v49 = vpop.eup %3346  ;;  %3105 = vmatpush3.bf16.msra.mxu1 %v3102_v61 }
 0x3a2   :  { %v3349_v51 = vpop.eup %3348  ;;  %2667 = vmatprep.mubr.f32.mxu0 %v3347_v49  ;;  %3107 = vmatprep.subr.bf16.mxu1 %v3106_v2 }
 0x3a3   :  { %2668 = vmatmul.mubr.f32.gmra.mrb[46].mxu0 %v3349_v51 }
 0x3a5   :  { %3109 = vmatpush3.bf16.msra.mxu1 %v3106_v2 }
 0x45a   :  { %v2648_v31 = vpop.f32.mrb[32].mxu0 }
 0x45b   :  { %v917_v23 = vadd.f32 %v2648_v31, %v4078_v20  ;;  %v911_v24 = vpop.f32.mrb[33].mxu0 }
 0x45c   :  { %v912_v32 = vadd.f32 %v4078_v20, %v911_v24 }
 0x45d   :  { %3350 = vtanh.f32 %v917_v23 }
 0x45e   :  { %3352 = vtanh.f32 %v912_v32  ;;  %v2651_v33 = vpop.f32.mrb[34].mxu0 }
 0x45f   :  { %v927_v34 = vadd.f32 %v2651_v33, %v4078_v20  ;;  %v921_v35 = vpop.f32.mrb[35].mxu0 }
 0x460   :  { %v922_v36 = vadd.f32 %v4078_v20, %v921_v35  ;;  %v2074_v35 = vld [vmem:[%s4568_s5 + $0x170] sm:$0xff] }
 0x461   :  { %3354 = vtanh.f32 %v927_v34 }
 0x462   :  { %3356 = vtanh.f32 %v922_v36  ;;  %v2654_v37 = vpop.f32.mrb[36].mxu0  ;;  %v2075_v36 = vld [vmem:[%s4568_s5 + $0x178] sm:$0xff] }
 0x463   :  { %v937_v38 = vadd.f32 %v2654_v37, %v4078_v20  ;;  %v931_v39 = vpop.f32.mrb[37].mxu0  ;;  %v3138_v37 = vpack.c.bf16 %v2075_v36, %v2074_v35 }
 0x464   :  { %v932_v40 = vadd.f32 %v4078_v20, %v931_v39  ;;  %v2079_v39 = vld [vmem:[%s4567_s3 + $0x188] sm:$0xff] }
 0x465   :  { %3358 = vtanh.f32 %v937_v38  ;;  %v2078_v38 = vld [vmem:[%s4567_s3 + $0x180] sm:$0xff] }
 0x466   :  { %3360 = vtanh.f32 %v932_v40  ;;  %v2657_v41 = vpop.f32.mrb[38].mxu0  ;;  %v2080_v40 = vld [vmem:[%s4567_s3 + $0x190] sm:$0xff] }
 0x467   :  { %v3351_v42 = vpop.eup %3350  ;;  %v947_v43 = vadd.f32 %v2657_v41, %v4078_v20  ;;  %v941_v44 = vpop.f32.mrb[39].mxu0  ;;  %v3142_v41 = vpack.c.bf16 %v2079_v39, %v2078_v38 }
 0x468   :  { %v3353_v47 = vpop.eup %3352  ;;  %v942_v48 = vadd.f32 %v4078_v20, %v941_v44  ;;  %v4092_v50 = vadd.f32 %v3351_v42, %v3890_v46  ;;  %v2081_v42 = vld [vmem:[%s4567_s3 + $0x198] sm:$0xff]  ;;  %v2082_v44 = vld [vmem:[%s4567_s3 + $0x1a0] sm:$0xff] }
 0x469   :  { %3362 = vtanh.f32 %v947_v43  ;;  %v4089_v49 = vadd.f32 %v3353_v47, %v3887_v45  ;;  %v3146_v43 = vpack.c.bf16 %v2081_v42, %v2080_v40  ;;  %v2083_v47 = vld [vmem:[%s4567_s3 + $0x1a8] sm:$0xff]  ;;  %3143 = vmatprep.subr.bf16.mxu1 %v3142_v41 }
 0x46a   :  { %3364 = vtanh.f32 %v942_v48  ;;  %v2660_v51 = vpop.f32.mrb[40].mxu0  ;;  %v3150_v48 = vpack.c.bf16 %v2083_v47, %v2082_v44 }
 0x46b   :  { %v3355_v52 = vpop.eup %3354  ;;  %v957_v53 = vadd.f32 %v2660_v51, %v4078_v20  ;;  %v951_v54 = vpop.f32.mrb[41].mxu0  ;;  %2702 = vmatprep.mubr.f32.mxu1 %v4089_v49  ;;  %v2084_v51 = vld [vmem:[%s4567_s3 + $0x1b0] sm:$0xff] }
 0x46c   :  { %v3357_v55 = vpop.eup %3356  ;;  %v952_v56 = vadd.f32 %v4078_v20, %v951_v54  ;;  %2703 = vmatmul.mubr.f32.vlgmr.msra.gmra.mrb[32].mxu1 %v4092_v50  ;;  %v4102_v46 = vadd.f32 %v3355_v52, %v3900_v60  ;;  %v2085_v52 = vld [vmem:[%s4567_s3 + $0x1b8] sm:$0xff]  ;;  %v4205_v54 = vld [vmem:[%s4570_s4 + $0x2] ss:$0 sm:$0xff] }
 0x46d   :  { %3366 = vtanh.f32 %v957_v53  ;;  %v4099_v45 = vadd.f32 %v3357_v55, %v3897_v59  ;;  %3145 = vmatpush3.bf16.msra.mxu1 %v3142_v41  ;;  %v3154_v53 = vpack.c.bf16 %v2085_v52, %v2084_v51 }
 0x46e   :  { %3368 = vtanh.f32 %v952_v56  ;;  %v2663_v57 = vpop.f32.mrb[42].mxu0  ;;  %3147 = vmatprep.subr.bf16.mxu1 %v3146_v43 }
 0x46f   :  { %v3359_v58 = vpop.eup %3358  ;;  %v967_v61 = vadd.f32 %v2663_v57, %v4078_v20  ;;  %v961_v62 = vpop.f32.mrb[43].mxu0  ;;  %2705 = vmatprep.mubr.f32.mxu1 %v4099_v45 }
 0x470   :  { %v3361_v1 = vpop.eup %3360  ;;  %v962_v2 = vadd.f32 %v4078_v20, %v961_v62  ;;  %2706 = vmatmul.mubr.f32.gmra.mrb[34].mxu1 %v4102_v46  ;;  %v4112_v60 = vadd.f32 %v3359_v58, %v3910_v0 }
 0x471   :  { %3370 = vtanh.f32 %v967_v61  ;;  %v4109_v59 = vadd.f32 %v3361_v1, %v3907_v63  ;;  %3149 = vmatpush3.bf16.msra.mxu1 %v3146_v43 }
 0x472   :  { %3372 = vtanh.f32 %v962_v2  ;;  %v2666_v5 = vpop.f32.mrb[44].mxu0  ;;  %3151 = vmatprep.subr.bf16.mxu1 %v3150_v48 }
 0x473   :  { %v3363_v6 = vpop.eup %3362  ;;  %v977_v9 = vadd.f32 %v2666_v5, %v4078_v20  ;;  %v971_v10 = vpop.f32.mrb[45].mxu0  ;;  %2708 = vmatprep.mubr.f32.mxu1 %v4109_v59 }
 0x474   :  { %v3365_v13 = vpop.eup %3364  ;;  %v972_v14 = vadd.f32 %v4078_v20, %v971_v10  ;;  %2709 = vmatmul.mubr.f32.gmra.mrb[36].mxu1 %v4112_v60  ;;  %v4122_v0 = vadd.f32 %v3363_v6, %v3920_v4 }
 0x475   :  { %3374 = vtanh.f32 %v977_v9  ;;  %v4119_v63 = vadd.f32 %v3365_v13, %v3917_v3  ;;  %3153 = vmatpush3.bf16.msra.mxu1 %v3150_v48 }
 0x476   :  { %3376 = vtanh.f32 %v972_v14  ;;  %v2669_v17 = vpop.f32.mrb[46].mxu0  ;;  %3155 = vmatprep.subr.bf16.mxu1 %v3154_v53 }
 0x477   :  { %v3367_v18 = vpop.eup %3366  ;;  %v987_v8 = vadd.f32 %v2669_v17, %v4078_v20  ;;  %v981_v22 = vpop.f32.mrb[47].mxu0  ;;  %2711 = vmatprep.mubr.f32.mxu1 %v4119_v63 }
 0x478   :  { %v3369_v27 = vpop.eup %3368  ;;  %v982_v11 = vadd.f32 %v4078_v20, %v981_v22  ;;  %2712 = vmatmul.mubr.f32.gmra.mrb[38].mxu1 %v4122_v0  ;;  %v4132_v29 = vadd.f32 %v3367_v18, %v3930_v21 }
 0x479   :  { %3378 = vtanh.f32 %v987_v8  ;;  %v4129_v3 = vadd.f32 %v3369_v27, %v3927_v7  ;;  %3157 = vmatpush3.bf16.msra.mxu1 %v3154_v53 }
 0x47a   :  { %3380 = vtanh.f32 %v982_v11 }
 0x47b   :  { %v3371_v4 = vpop.eup %3370  ;;  %2714 = vmatprep.mubr.f32.mxu1 %v4129_v3 }
 0x47c   :  { %v3373_v15 = vpop.eup %3372  ;;  %2715 = vmatmul.mubr.f32.gmra.mrb[40].mxu1 %v4132_v29  ;;  %v4140_v20 = vadd.f32 %v3371_v4, %v3938_v26 }
 0x47d   :  { %v4137_v19 = vadd.f32 %v3373_v15, %v3935_v25 }
 0x47f   :  { %v3375_v31 = vpop.eup %3374  ;;  %2717 = vmatprep.mubr.f32.mxu1 %v4137_v19 }
 0x480   :  { %v3377_v7 = vpop.eup %3376  ;;  %2718 = vmatmul.mubr.f32.gmra.mrb[42].mxu1 %v4140_v20  ;;  %v4148_v23 = vadd.f32 %v3375_v31, %v3946_v28  ;;  %v2071_v28 = vld [vmem:[%s4568_s5 + $0x158] sm:$0xff] }
 0x481   :  { %v4145_v21 = vadd.f32 %v3377_v7, %v3943_v12  ;;  %v2070_v12 = vld [vmem:[%s4568_s5 + $0x150] sm:$0xff] }
 0x482   :  { %v3130_v33 = vpack.c.bf16 %v2071_v28, %v2070_v12 }
 0x483   :  { %v3379_v24 = vpop.eup %3378  ;;  %2720 = vmatprep.mubr.f32.mxu1 %v4145_v21 }
 0x484   :  { %v3381_v25 = vpop.eup %3380  ;;  %2721 = vmatmul.mubr.f32.gmra.mrb[44].mxu1 %v4148_v23  ;;  %v4156_v32 = vadd.f32 %v3379_v24, %v3954_v30  ;;  %3131 = vmatprep.subr.bf16.mxu0 %v3130_v33  ;;  %v2073_v30 = vld [vmem:[%s4568_s5 + $0x168] sm:$0xff] }
 0x485   :  { %v4153_v26 = vadd.f32 %v3381_v25, %v3951_v16  ;;  %3133 = vmatpush3.bf16.msra.mxu0 %v3130_v33  ;;  %v2072_v16 = vld [vmem:[%s4568_s5 + $0x160] sm:$0xff] }
 0x486   :  { %v3134_v34 = vpack.c.bf16 %v2073_v30, %v2072_v16 }
 0x487   :  { %2723 = vmatprep.mubr.f32.mxu1 %v4153_v26 }
 0x488   :  { %2724 = vmatmul.mubr.f32.gmra.mrb[46].mxu1 %v4156_v32  ;;  %3135 = vmatprep.subr.bf16.mxu0 %v3134_v34 }
 0x489   :  { %3137 = vmatpush3.bf16.msra.mxu0 %v3134_v34 }
 0x48a   :  { %3139 = vmatprep.subr.bf16.mxu0 %v3138_v37 }
 0x48d   :  { %3141 = vmatpush3.bf16.msra.mxu0 %v3138_v37 }
 0x53f   :  { %v2704_v55 = vpop.f32.mrb[32].mxu1 }
 0x540   :  { %v1119_v56 = vadd.f32 %v2704_v55, %v4205_v54  ;;  %v1113_v57 = vpop.f32.mrb[33].mxu1 }
 0x541   :  { %v1114_v58 = vadd.f32 %v4205_v54, %v1113_v57 }
 0x543   :  { %3382 = vtanh.f32 %v1114_v58  ;;  %v2707_v61 = vpop.f32.mrb[34].mxu1  ;;  %v2088_v58 = vld [vmem:[%s4567_s3 + $0x1d0] sm:$0xff] }
 0x544   :  { %3384 = vtanh.f32 %v1119_v56  ;;  %v1129_v62 = vadd.f32 %v2707_v61, %v4205_v54  ;;  %v1123_v1 = vpop.f32.mrb[35].mxu1  ;;  %v2087_v56 = vld [vmem:[%s4567_s3 + $0x1c8] sm:$0xff]  ;;  %v2089_v61 = vld [vmem:[%s4567_s3 + $0x1d8] sm:$0xff] }
 0x545   :  { %v1124_v2 = vadd.f32 %v4205_v54, %v1123_v1  ;;  %v2090_v1 = vld [vmem:[%s4567_s3 + $0x1e0] sm:$0xff] }
 0x547   :  { %3386 = vtanh.f32 %v1124_v2  ;;  %v2710_v5 = vpop.f32.mrb[36].mxu1  ;;  %v2091_v2 = vld [vmem:[%s4567_s3 + $0x1e8] sm:$0xff] }
 0x548   :  { %3388 = vtanh.f32 %v1129_v62  ;;  %v1139_v6 = vadd.f32 %v2710_v5, %v4205_v54  ;;  %v1133_v9 = vpop.f32.mrb[37].mxu1  ;;  %v3162_v62 = vpack.c.bf16 %v2089_v61, %v2088_v58  ;;  %v3166_v5 = vpack.c.bf16 %v2091_v2, %v2090_v1 }
 0x549   :  { %v1134_v10 = vadd.f32 %v4205_v54, %v1133_v9  ;;  %v2093_v9 = vld [vmem:[%s4567_s3 + $0x1f8] sm:$0xff] }
 0x54b   :  { %3390 = vtanh.f32 %v1134_v10  ;;  %v2713_v13 = vpop.f32.mrb[38].mxu1 }
 0x54c   :  { %3392 = vtanh.f32 %v1139_v6  ;;  %v1149_v14 = vadd.f32 %v2713_v13, %v4205_v54  ;;  %v1143_v17 = vpop.f32.mrb[39].mxu1  ;;  %v2092_v6 = vld [vmem:[%s4567_s3 + $0x1f0] sm:$0xff]  ;;  %v2096_v13 = vld [vmem:[%s4568_s5 + $0x180] sm:$0xff] }
 0x54d   :  { %v3383_v18 = vpop.eup %3382  ;;  %v1144_v8 = vadd.f32 %v4205_v54, %v1143_v17  ;;  %v3170_v10 = vpack.c.bf16 %v2093_v9, %v2092_v6  ;;  %v2098_v17 = vld [vmem:[%s4568_s5 + $0x190] sm:$0xff] }
 0x54e   :  { %v3385_v22 = vpop.eup %3384  ;;  %2758 = vmatprep.mubr.f32.mxu0 %v3383_v18 }
 0x54f   :  { %3394 = vtanh.f32 %v1144_v8  ;;  %v2716_v27 = vpop.f32.mrb[40].mxu1  ;;  %2759 = vmatmul.mubr.f32.vlgmr.msra.gmra.mrb[48].mxu0 %v3385_v22  ;;  %v2099_v8 = vld [vmem:[%s4568_s5 + $0x198] sm:$0xff] }
 0x550   :  { %3396 = vtanh.f32 %v1149_v14  ;;  %v1159_v11 = vadd.f32 %v2716_v27, %v4205_v54  ;;  %v1153_v4 = vpop.f32.mrb[41].mxu1  ;;  %v2097_v14 = vld [vmem:[%s4568_s5 + $0x188] sm:$0xff]  ;;  %v3178_v22 = vpack.c.bf16 %v2099_v8, %v2098_v17  ;;  %v2100_v27 = vld [vmem:[%s4568_s5 + $0x1a0] sm:$0xff] }
 0x551   :  { %v3387_v15 = vpop.eup %3386  ;;  %v1154_v31 = vadd.f32 %v4205_v54, %v1153_v4  ;;  %v3174_v18 = vpack.c.bf16 %v2097_v14, %v2096_v13 }
 0x552   :  { %v3389_v7 = vpop.eup %3388  ;;  %2761 = vmatprep.mubr.f32.mxu0 %v3387_v15  ;;  %v2102_v15 = vld [vmem:[%s4568_s5 + $0x1b0] sm:$0xff] }
 0x553   :  { %3398 = vtanh.f32 %v1154_v31  ;;  %v2719_v24 = vpop.f32.mrb[42].mxu1  ;;  %2762 = vmatmul.mubr.f32.gmra.mrb[50].mxu0 %v3389_v7  ;;  %3175 = vmatprep.subr.bf16.mxu0 %v3174_v18  ;;  %v2103_v31 = vld [vmem:[%s4568_s5 + $0x1b8] sm:$0xff] }
 0x554   :  { %3400 = vtanh.f32 %v1159_v11  ;;  %v1169_v25 = vadd.f32 %v2719_v24, %v4205_v54  ;;  %v1163_v12 = vpop.f32.mrb[43].mxu1  ;;  %v2101_v11 = vld [vmem:[%s4568_s5 + $0x1a8] sm:$0xff]  ;;  %3177 = vmatpush3.bf16.msra.mxu0 %v3174_v18  ;;  %v3186_v7 = vpack.c.bf16 %v2103_v31, %v2102_v15  ;;  %v2104_v24 = vld [vmem:[%s4568_s5 + $0x1c0] sm:$0xff] }
 0x555   :  { %v3391_v28 = vpop.eup %3390  ;;  %v1164_v33 = vadd.f32 %v4205_v54, %v1163_v12  ;;  %3179 = vmatprep.subr.bf16.mxu0 %v3178_v22  ;;  %v3182_v4 = vpack.c.bf16 %v2101_v11, %v2100_v27 }
 0x556   :  { %v3393_v16 = vpop.eup %3392  ;;  %2764 = vmatprep.mubr.f32.mxu0 %v3391_v28  ;;  %v4280_v28 = vld [vmem:[%s4571_s6 + $0x2] ss:$0 sm:$0xff] }
 0x557   :  { %3402 = vtanh.f32 %v1164_v33  ;;  %v2722_v30 = vpop.f32.mrb[44].mxu1  ;;  %2765 = vmatmul.mubr.f32.gmra.mrb[52].mxu0 %v3393_v16 }
 0x558   :  { %3404 = vtanh.f32 %v1169_v25  ;;  %v1179_v34 = vadd.f32 %v2722_v30, %v4205_v54  ;;  %v1173_v35 = vpop.f32.mrb[45].mxu1  ;;  %3181 = vmatpush3.bf16.msra.mxu0 %v3178_v22  ;;  %v2105_v25 = vld [vmem:[%s4568_s5 + $0x1c8] sm:$0xff] }
 0x559   :  { %v3395_v36 = vpop.eup %3394  ;;  %v1174_v37 = vadd.f32 %v4205_v54, %v1173_v35  ;;  %3183 = vmatprep.subr.bf16.mxu0 %v3182_v4  ;;  %v3190_v12 = vpack.c.bf16 %v2105_v25, %v2104_v24 }
 0x55a   :  { %v3397_v38 = vpop.eup %3396  ;;  %2767 = vmatprep.mubr.f32.mxu0 %v3395_v36 }
 0x55b   :  { %3406 = vtanh.f32 %v1174_v37  ;;  %v2725_v39 = vpop.f32.mrb[46].mxu1  ;;  %2768 = vmatmul.mubr.f32.gmra.mrb[54].mxu0 %v3397_v38 }
 0x55c   :  { %3408 = vtanh.f32 %v1179_v34  ;;  %v1189_v40 = vadd.f32 %v2725_v39, %v4205_v54  ;;  %v1183_v41 = vpop.f32.mrb[47].mxu1  ;;  %3185 = vmatpush3.bf16.msra.mxu0 %v3182_v4 }
 0x55d   :  { %v3399_v42 = vpop.eup %3398  ;;  %v1184_v43 = vadd.f32 %v4205_v54, %v1183_v41  ;;  %v2086_v54 = vld [vmem:[%s4567_s3 + $0x1c0] sm:$0xff]  ;;  %3187 = vmatprep.subr.bf16.mxu0 %v3186_v7 }
 0x55e   :  { %v3401_v44 = vpop.eup %3400  ;;  %2770 = vmatprep.mubr.f32.mxu0 %v3399_v42  ;;  %v3158_v57 = vpack.c.bf16 %v2087_v56, %v2086_v54 }
 0x55f   :  { %3410 = vtanh.f32 %v1184_v43  ;;  %2771 = vmatmul.mubr.f32.gmra.mrb[56].mxu0 %v3401_v44 }
 0x560   :  { %3412 = vtanh.f32 %v1189_v40  ;;  %3159 = vmatprep.subr.bf16.mxu1 %v3158_v57  ;;  %3189 = vmatpush3.bf16.msra.mxu0 %v3186_v7 }
 0x561   :  { %v3403_v47 = vpop.eup %3402  ;;  %3161 = vmatpush3.bf16.msra.mxu1 %v3158_v57  ;;  %3191 = vmatprep.subr.bf16.mxu0 %v3190_v12 }
 0x562   :  { %v3405_v48 = vpop.eup %3404  ;;  %2773 = vmatprep.mubr.f32.mxu0 %v3403_v47  ;;  %3163 = vmatprep.subr.bf16.mxu1 %v3162_v62 }
 0x563   :  { %2774 = vmatmul.mubr.f32.gmra.mrb[58].mxu0 %v3405_v48 }
 0x564   :  { %3193 = vmatpush3.bf16.msra.mxu0 %v3190_v12 }
 0x565   :  { %v3407_v51 = vpop.eup %3406  ;;  %3165 = vmatpush3.bf16.msra.mxu1 %v3162_v62 }
 0x566   :  { %v3409_v52 = vpop.eup %3408  ;;  %2776 = vmatprep.mubr.f32.mxu0 %v3407_v51  ;;  %3167 = vmatprep.subr.bf16.mxu1 %v3166_v5 }
 0x567   :  { %2777 = vmatmul.mubr.f32.gmra.mrb[60].mxu0 %v3409_v52 }
 0x569   :  { %v3411_v53 = vpop.eup %3410  ;;  %3169 = vmatpush3.bf16.msra.mxu1 %v3166_v5 }
 0x56a   :  { %v3413_v55 = vpop.eup %3412  ;;  %2779 = vmatprep.mubr.f32.mxu0 %v3411_v53  ;;  %3171 = vmatprep.subr.bf16.mxu1 %v3170_v10 }
 0x56b   :  { %2780 = vmatmul.mubr.f32.gmra.mrb[62].mxu0 %v3413_v55 }
 0x56d   :  { %3173 = vmatpush3.bf16.msra.mxu1 %v3170_v10 }
 0x622   :  { %v2760_v33 = vpop.f32.mrb[48].mxu0 }
 0x623   :  { %v1305_v16 = vadd.f32 %v2760_v33, %v4280_v28  ;;  %v1299_v30 = vpop.f32.mrb[49].mxu0 }
 0x624   :  { %v1300_v34 = vadd.f32 %v4280_v28, %v1299_v30 }
 0x625   :  { %3414 = vtanh.f32 %v1305_v16 }
 0x626   :  { %3416 = vtanh.f32 %v1300_v34  ;;  %v2763_v35 = vpop.f32.mrb[50].mxu0 }
 0x627   :  { %v1315_v36 = vadd.f32 %v2763_v35, %v4280_v28  ;;  %v1309_v37 = vpop.f32.mrb[51].mxu0 }
 0x628   :  { %v1310_v38 = vadd.f32 %v4280_v28, %v1309_v37  ;;  %v2110_v37 = vld [vmem:[%s4568_s5 + $0x1f0] sm:$0xff] }
 0x629   :  { %3418 = vtanh.f32 %v1315_v36 }
 0x62a   :  { %3420 = vtanh.f32 %v1310_v38  ;;  %v2766_v39 = vpop.f32.mrb[52].mxu0  ;;  %v2111_v38 = vld [vmem:[%s4568_s5 + $0x1f8] sm:$0xff] }
 0x62b   :  { %v1325_v40 = vadd.f32 %v2766_v39, %v4280_v28  ;;  %v1319_v41 = vpop.f32.mrb[53].mxu0  ;;  %v3202_v39 = vpack.c.bf16 %v2111_v38, %v2110_v37 }
 0x62c   :  { %v1320_v42 = vadd.f32 %v4280_v28, %v1319_v41  ;;  %v1799_v41 = vld [vmem:[%s4572_s7 + $0x8] sm:$0xff] }
 0x62d   :  { %3422 = vtanh.f32 %v1325_v40  ;;  %v1798_v40 = vld [vmem:[%s4572_s7] sm:$0xff] }
 0x62e   :  { %3424 = vtanh.f32 %v1320_v42  ;;  %v2769_v43 = vpop.f32.mrb[54].mxu0  ;;  %v1800_v42 = vld [vmem:[%s4572_s7 + $0x10] sm:$0xff] }
 0x62f   :  { %v3415_v44 = vpop.eup %3414  ;;  %v1335_v47 = vadd.f32 %v2769_v43, %v4280_v28  ;;  %v1329_v48 = vpop.f32.mrb[55].mxu0  ;;  %v3206_v43 = vpack.c.bf16 %v1799_v41, %v1798_v40 }
 0x630   :  { %v3417_v51 = vpop.eup %3416  ;;  %v1330_v52 = vadd.f32 %v4280_v28, %v1329_v48  ;;  %v4294_v54 = vadd.f32 %v3415_v44, %v4092_v50  ;;  %v1801_v44 = vld [vmem:[%s4572_s7 + $0x18] sm:$0xff]  ;;  %v1802_v48 = vld [vmem:[%s4572_s7 + $0x20] sm:$0xff] }
 0x631   :  { %3426 = vtanh.f32 %v1335_v47  ;;  %v4291_v53 = vadd.f32 %v3417_v51, %v4089_v49  ;;  %v3210_v47 = vpack.c.bf16 %v1801_v44, %v1800_v42  ;;  %3238 = vmatprep.subr.bf16.mxu1 %v3206_v43  ;;  %v1803_v51 = vld [vmem:[%s4572_s7 + $0x28] sm:$0xff] }
 0x632   :  { %3428 = vtanh.f32 %v1330_v52  ;;  %v2772_v55 = vpop.f32.mrb[56].mxu0  ;;  %v4398_v52 = vpack.c.bf16 %v1803_v51, %v1802_v48 }
 0x633   :  { %v3419_v56 = vpop.eup %3418  ;;  %v1345_v57 = vadd.f32 %v2772_v55, %v4280_v28  ;;  %v1339_v58 = vpop.f32.mrb[57].mxu0  ;;  %2814 = vmatprep.mubr.f32.mxu1 %v4291_v53  ;;  %v1804_v55 = vld [vmem:[%s4572_s7 + $0x30] sm:$0xff] }
 0x634   :  { %v3421_v61 = vpop.eup %3420  ;;  %v1340_v62 = vadd.f32 %v4280_v28, %v1339_v58  ;;  %2815 = vmatmul.mubr.f32.vlgmr.msra.gmra.mrb[48].mxu1 %v4294_v54  ;;  %v4304_v50 = vadd.f32 %v3419_v56, %v4102_v46  ;;  %v1805_v56 = vld [vmem:[%s4572_s7 + $0x38] sm:$0xff]  ;;  %v4415_v58 = vld [vmem:[%s4570_s4 + $0x3] ss:$0 sm:$0xff] }
 0x635   :  { %3430 = vtanh.f32 %v1345_v57  ;;  %v4301_v49 = vadd.f32 %v3421_v61, %v4099_v45  ;;  %3246 = vmatpush3.bf16.msra.mxu1 %v3206_v43  ;;  %v4407_v57 = vpack.c.bf16 %v1805_v56, %v1804_v55 }
 0x636   :  { %3432 = vtanh.f32 %v1340_v62  ;;  %v2775_v1 = vpop.f32.mrb[58].mxu0  ;;  %3239 = vmatprep.subr.bf16.mxu1 %v3210_v47 }
 0x637   :  { %v3423_v2 = vpop.eup %3422  ;;  %v1355_v5 = vadd.f32 %v2775_v1, %v4280_v28  ;;  %v1349_v6 = vpop.f32.mrb[59].mxu0  ;;  %2817 = vmatprep.mubr.f32.mxu1 %v4301_v49 }
 0x638   :  { %v3425_v9 = vpop.eup %3424  ;;  %v1350_v10 = vadd.f32 %v4280_v28, %v1349_v6  ;;  %2818 = vmatmul.mubr.f32.gmra.mrb[50].mxu1 %v4304_v50  ;;  %v4314_v46 = vadd.f32 %v3423_v2, %v4112_v60 }
 0x639   :  { %3434 = vtanh.f32 %v1355_v5  ;;  %v4311_v45 = vadd.f32 %v3425_v9, %v4109_v59  ;;  %3247 = vmatpush3.bf16.msra.mxu1 %v3210_v47 }
 0x63a   :  { %3436 = vtanh.f32 %v1350_v10  ;;  %v2778_v13 = vpop.f32.mrb[60].mxu0  ;;  %3240 = vmatprep.subr.bf16.mxu1 %v4398_v52 }
 0x63b   :  { %v3427_v14 = vpop.eup %3426  ;;  %v1365_v17 = vadd.f32 %v2778_v13, %v4280_v28  ;;  %v1359_v18 = vpop.f32.mrb[61].mxu0  ;;  %2820 = vmatprep.mubr.f32.mxu1 %v4311_v45 }
 0x63c   :  { %v3429_v8 = vpop.eup %3428  ;;  %v1360_v22 = vadd.f32 %v4280_v28, %v1359_v18  ;;  %2821 = vmatmul.mubr.f32.gmra.mrb[52].mxu1 %v4314_v46  ;;  %v4324_v60 = vadd.f32 %v3427_v14, %v4122_v0 }
 0x63d   :  { %3438 = vtanh.f32 %v1365_v17  ;;  %v4321_v59 = vadd.f32 %v3429_v8, %v4119_v63  ;;  %3248 = vmatpush3.bf16.msra.mxu1 %v4398_v52 }
 0x63e   :  { %3440 = vtanh.f32 %v1360_v22  ;;  %v2781_v27 = vpop.f32.mrb[62].mxu0  ;;  %3241 = vmatprep.subr.bf16.mxu1 %v4407_v57 }
 0x63f   :  { %v3431_v11 = vpop.eup %3430  ;;  %v1375_v4 = vadd.f32 %v2781_v27, %v4280_v28  ;;  %v1369_v15 = vpop.f32.mrb[63].mxu0  ;;  %2823 = vmatprep.mubr.f32.mxu1 %v4321_v59 }
 0x640   :  { %v3433_v31 = vpop.eup %3432  ;;  %v1370_v7 = vadd.f32 %v4280_v28, %v1369_v15  ;;  %2824 = vmatmul.mubr.f32.gmra.mrb[54].mxu1 %v4324_v60  ;;  %v4334_v24 = vadd.f32 %v3431_v11, %v4132_v29 }
 0x641   :  { %3442 = vtanh.f32 %v1375_v4  ;;  %v4331_v63 = vadd.f32 %v3433_v31, %v4129_v3  ;;  %3249 = vmatpush3.bf16.msra.mxu1 %v4407_v57 }
 0x642   :  { %3444 = vtanh.f32 %v1370_v7 }
 0x643   :  { %v3435_v0 = vpop.eup %3434  ;;  %2826 = vmatprep.mubr.f32.mxu1 %v4331_v63 }
 0x644   :  { %v3437_v25 = vpop.eup %3436  ;;  %2827 = vmatmul.mubr.f32.gmra.mrb[56].mxu1 %v4334_v24  ;;  %v4342_v28 = vadd.f32 %v3435_v0, %v4140_v20 }
 0x645   :  { %v4339_v12 = vadd.f32 %v3437_v25, %v4137_v19 }
 0x647   :  { %v3439_v33 = vpop.eup %3438  ;;  %2829 = vmatprep.mubr.f32.mxu1 %v4339_v12 }
 0x648   :  { %v3441_v3 = vpop.eup %3440  ;;  %2830 = vmatmul.mubr.f32.gmra.mrb[58].mxu1 %v4342_v28  ;;  %v4350_v16 = vadd.f32 %v3439_v33, %v4148_v23  ;;  %v2107_v23 = vld [vmem:[%s4568_s5 + $0x1d8] sm:$0xff] }
 0x649   :  { %v4347_v29 = vadd.f32 %v3441_v3, %v4145_v21  ;;  %v2106_v21 = vld [vmem:[%s4568_s5 + $0x1d0] sm:$0xff] }
 0x64a   :  { %v3194_v35 = vpack.c.bf16 %v2107_v23, %v2106_v21 }
 0x64b   :  { %v3443_v30 = vpop.eup %3442  ;;  %2832 = vmatprep.mubr.f32.mxu1 %v4347_v29 }
 0x64c   :  { %v3445_v19 = vpop.eup %3444  ;;  %2833 = vmatmul.mubr.f32.gmra.mrb[60].mxu1 %v4350_v16  ;;  %v4358_v34 = vadd.f32 %v3443_v30, %v4156_v32  ;;  %3195 = vmatprep.subr.bf16.mxu0 %v3194_v35  ;;  %v2109_v32 = vld [vmem:[%s4568_s5 + $0x1e8] sm:$0xff] }
 0x64d   :  { %v4355_v20 = vadd.f32 %v3445_v19, %v4153_v26  ;;  %3197 = vmatpush3.bf16.msra.mxu0 %v3194_v35  ;;  %v2108_v26 = vld [vmem:[%s4568_s5 + $0x1e0] sm:$0xff] }
 0x64e   :  { %v3198_v36 = vpack.c.bf16 %v2109_v32, %v2108_v26 }
 0x64f   :  { %2835 = vmatprep.mubr.f32.mxu1 %v4355_v20 }
 0x650   :  { %2836 = vmatmul.mubr.f32.gmra.mrb[62].mxu1 %v4358_v34  ;;  %3199 = vmatprep.subr.bf16.mxu0 %v3198_v36 }
 0x651   :  { %3201 = vmatpush3.bf16.msra.mxu0 %v3198_v36 }
 0x652   :  { %3203 = vmatprep.subr.bf16.mxu0 %v3202_v39 }
 0x655   :  { %3205 = vmatpush3.bf16.msra.mxu0 %v3202_v39 }
 0x656   :  { %3207 = vmatprep.subr.bf16.mxu0 %v3206_v43 }
 0x707   :  { %v2816_v61 = vpop.f32.mrb[48].mxu1 }
 0x708   :  { %v1507_v62 = vadd.f32 %v2816_v61, %v4415_v58  ;;  %v1501_v1 = vpop.f32.mrb[49].mxu1 }
 0x709   :  { %v1502_v2 = vadd.f32 %v4415_v58, %v1501_v1 }
 0x70b   :  { %3446 = vtanh.f32 %v1502_v2  ;;  %v2819_v5 = vpop.f32.mrb[50].mxu1  ;;  %v1808_v2 = vld [vmem:[%s4572_s7 + $0x50] sm:$0xff] }
 0x70c   :  { %3448 = vtanh.f32 %v1507_v62  ;;  %v1517_v6 = vadd.f32 %v2819_v5, %v4415_v58  ;;  %v1511_v9 = vpop.f32.mrb[51].mxu1  ;;  %v1809_v5 = vld [vmem:[%s4572_s7 + $0x58] sm:$0xff] }
 0x70d   :  { %v1512_v10 = vadd.f32 %v4415_v58, %v1511_v9  ;;  %v1810_v9 = vld [vmem:[%s4572_s7 + $0x60] sm:$0xff] }
 0x70f   :  { %3450 = vtanh.f32 %v1512_v10  ;;  %v2822_v13 = vpop.f32.mrb[52].mxu1  ;;  %v1811_v10 = vld [vmem:[%s4572_s7 + $0x68] sm:$0xff] }
 0x710   :  { %3452 = vtanh.f32 %v1517_v6  ;;  %v1527_v14 = vadd.f32 %v2822_v13, %v4415_v58  ;;  %v1521_v17 = vpop.f32.mrb[53].mxu1  ;;  %v3226_v6 = vpack.c.bf16 %v1809_v5, %v1808_v2  ;;  %v3230_v13 = vpack.c.bf16 %v1811_v10, %v1810_v9 }
 0x711   :  { %v1522_v18 = vadd.f32 %v4415_v58, %v1521_v17  ;;  %v1813_v17 = vld [vmem:[%s4572_s7 + $0x78] sm:$0xff] }
 0x713   :  { %3454 = vtanh.f32 %v1522_v18  ;;  %v2825_v8 = vpop.f32.mrb[54].mxu1 }
 0x714   :  { %3456 = vtanh.f32 %v1527_v14  ;;  %v1537_v22 = vadd.f32 %v2825_v8, %v4415_v58  ;;  %v1531_v27 = vpop.f32.mrb[55].mxu1  ;;  %v1812_v14 = vld [vmem:[%s4572_s7 + $0x70] sm:$0xff]  ;;  %v4464_v8 = vld [vmem:[%s4571_s6 + $0x3] ss:$0 sm:$0xff] }
 0x715   :  { %v3447_v11 = vpop.eup %3446  ;;  %v1532_v4 = vadd.f32 %v4415_v58, %v1531_v27  ;;  %v3234_v18 = vpack.c.bf16 %v1813_v17, %v1812_v14 }
 0x716   :  { %v3449_v15 = vpop.eup %3448  ;;  %2870 = vmatprep.mubr.f32.mxu0 %v3447_v11 }
 0x717   :  { %3458 = vtanh.f32 %v1532_v4  ;;  %v2828_v31 = vpop.f32.mrb[56].mxu1  ;;  %2871 = vmatmul.mubr.f32.vlgmr.msra.gmra.mrb[64].mxu0 %v3449_v15 }
 0x718   :  { %3460 = vtanh.f32 %v1537_v22  ;;  %v1547_v7 = vadd.f32 %v2828_v31, %v4415_v58  ;;  %v1541_v0 = vpop.f32.mrb[57].mxu1  ;;  %3209 = vmatpush3.bf16.msra.mxu0 %v3206_v43 }
 0x719   :  { %v3451_v25 = vpop.eup %3450  ;;  %v1542_v33 = vadd.f32 %v4415_v58, %v1541_v0  ;;  %3211 = vmatprep.subr.bf16.mxu0 %v3210_v47 }
 0x71a   :  { %v3453_v3 = vpop.eup %3452  ;;  %2873 = vmatprep.mubr.f32.mxu0 %v3451_v25 }
 0x71b   :  { %3462 = vtanh.f32 %v1542_v33  ;;  %v2831_v30 = vpop.f32.mrb[58].mxu1  ;;  %2874 = vmatmul.mubr.f32.gmra.mrb[66].mxu0 %v3453_v3 }
 0x71c   :  { %3464 = vtanh.f32 %v1547_v7  ;;  %v1557_v19 = vadd.f32 %v2831_v30, %v4415_v58  ;;  %v1551_v21 = vpop.f32.mrb[59].mxu1  ;;  %3213 = vmatpush3.bf16.msra.mxu0 %v3210_v47 }
 0x71d   :  { %v3455_v23 = vpop.eup %3454  ;;  %v1552_v35 = vadd.f32 %v4415_v58, %v1551_v21  ;;  %3215 = vmatprep.subr.bf16.mxu0 %v4398_v52 }
 0x71e   :  { %v3457_v26 = vpop.eup %3456  ;;  %2876 = vmatprep.mubr.f32.mxu0 %v3455_v23 }
 0x71f   :  { %3466 = vtanh.f32 %v1552_v35  ;;  %v2834_v32 = vpop.f32.mrb[60].mxu1  ;;  %2877 = vmatmul.mubr.f32.gmra.mrb[68].mxu0 %v3457_v26 }
 0x720   :  { %3468 = vtanh.f32 %v1557_v19  ;;  %v1567_v36 = vadd.f32 %v2834_v32, %v4415_v58  ;;  %v1561_v37 = vpop.f32.mrb[61].mxu1  ;;  %3217 = vmatpush3.bf16.msra.mxu0 %v4398_v52 }
 0x721   :  { %v3459_v38 = vpop.eup %3458  ;;  %v1562_v39 = vadd.f32 %v4415_v58, %v1561_v37  ;;  %3219 = vmatprep.subr.bf16.mxu0 %v4407_v57 }
 0x722   :  { %v3461_v40 = vpop.eup %3460  ;;  %2879 = vmatprep.mubr.f32.mxu0 %v3459_v38 }
 0x723   :  { %3470 = vtanh.f32 %v1562_v39  ;;  %v2837_v41 = vpop.f32.mrb[62].mxu1  ;;  %2880 = vmatmul.mubr.f32.gmra.mrb[70].mxu0 %v3461_v40 }
 0x724   :  { %3472 = vtanh.f32 %v1567_v36  ;;  %v1577_v42 = vadd.f32 %v2837_v41, %v4415_v58  ;;  %v1571_v43 = vpop.f32.mrb[63].mxu1  ;;  %3221 = vmatpush3.bf16.msra.mxu0 %v4407_v57  ;;  %v1806_v57 = vld [vmem:[%s4572_s7 + $0x40] sm:$0xff] }
 0x725   :  { %v3463_v44 = vpop.eup %3462  ;;  %v1572_v47 = vadd.f32 %v4415_v58, %v1571_v43  ;;  %v1807_v58 = vld [vmem:[%s4572_s7 + $0x48] sm:$0xff] }
 0x726   :  { %v3465_v48 = vpop.eup %3464  ;;  %2882 = vmatprep.mubr.f32.mxu0 %v3463_v44  ;;  %v3222_v1 = vpack.c.bf16 %v1807_v58, %v1806_v57 }
 0x727   :  { %3474 = vtanh.f32 %v1572_v47  ;;  %2883 = vmatmul.mubr.f32.gmra.mrb[72].mxu0 %v3465_v48 }
 0x728   :  { %3476 = vtanh.f32 %v1577_v42  ;;  %3223 = vmatprep.subr.bf16.mxu0 %v3222_v1  ;;  %3242 = vmatprep.subr.bf16.mxu1 %v3222_v1 }
 0x729   :  { %v3467_v51 = vpop.eup %3466  ;;  %3225 = vmatpush3.bf16.msra.mxu0 %v3222_v1  ;;  %3250 = vmatpush3.bf16.msra.mxu1 %v3222_v1 }
 0x72a   :  { %v3469_v52 = vpop.eup %3468  ;;  %2885 = vmatprep.mubr.f32.mxu0 %v3467_v51  ;;  %3227 = vmatprep.subr.bf16.mxu0 %v3226_v6 }
 0x72b   :  { %2886 = vmatmul.mubr.f32.gmra.mrb[74].mxu0 %v3469_v52  ;;  %3243 = vmatprep.subr.bf16.mxu1 %v3226_v6 }
 0x72d   :  { %v3471_v55 = vpop.eup %3470  ;;  %3229 = vmatpush3.bf16.msra.mxu0 %v3226_v6  ;;  %3251 = vmatpush3.bf16.msra.mxu1 %v3226_v6 }
 0x72e   :  { %v3473_v56 = vpop.eup %3472  ;;  %2888 = vmatprep.mubr.f32.mxu0 %v3471_v55  ;;  %3231 = vmatprep.subr.bf16.mxu0 %v3230_v13 }
 0x72f   :  { %2889 = vmatmul.mubr.f32.gmra.mrb[76].mxu0 %v3473_v56  ;;  %3244 = vmatprep.subr.bf16.mxu1 %v3230_v13 }
 0x731   :  { %v3475_v61 = vpop.eup %3474  ;;  %3233 = vmatpush3.bf16.msra.mxu0 %v3230_v13  ;;  %3252 = vmatpush3.bf16.msra.mxu1 %v3230_v13 }
 0x732   :  { %v3477_v62 = vpop.eup %3476  ;;  %2891 = vmatprep.mubr.f32.mxu0 %v3475_v61  ;;  %3235 = vmatprep.subr.bf16.mxu0 %v3234_v18 }
 0x733   :  { %2892 = vmatmul.mubr.f32.gmra.mrb[78].mxu0 %v3477_v62  ;;  %3245 = vmatprep.subr.bf16.mxu1 %v3234_v18 }
 0x735   :  { %3237 = vmatpush3.bf16.msra.mxu0 %v3234_v18  ;;  %3253 = vmatpush3.bf16.msra.mxu1 %v3234_v18 }
 0x7ea   :  { %v2872_v22 = vpop.f32.mrb[64].mxu0 }
 0x7eb   :  { %v1693_v27 = vadd.f32 %v2872_v22, %v4464_v8  ;;  %v1687_v11 = vpop.f32.mrb[65].mxu0 }
 0x7ec   :  { %v1688_v4 = vadd.f32 %v4464_v8, %v1687_v11 }
 0x7ed   :  { %3478 = vtanh.f32 %v1693_v27 }
 0x7ee   :  { %3480 = vtanh.f32 %v1688_v4  ;;  %v2875_v15 = vpop.f32.mrb[66].mxu0 }
 0x7ef   :  { %v1703_v31 = vadd.f32 %v2875_v15, %v4464_v8  ;;  %v1697_v7 = vpop.f32.mrb[67].mxu0 }
 0x7f0   :  { %v1698_v0 = vadd.f32 %v4464_v8, %v1697_v7 }
 0x7f1   :  { %3482 = vtanh.f32 %v1703_v31 }
 0x7f2   :  { %3484 = vtanh.f32 %v1698_v0  ;;  %v2878_v25 = vpop.f32.mrb[68].mxu0 }
 0x7f3   :  { %v1713_v33 = vadd.f32 %v2878_v25, %v4464_v8  ;;  %v1707_v3 = vpop.f32.mrb[69].mxu0 }
 0x7f4   :  { %v1708_v30 = vadd.f32 %v4464_v8, %v1707_v3 }
 0x7f5   :  { %3486 = vtanh.f32 %v1713_v33 }
 0x7f6   :  { %3488 = vtanh.f32 %v1708_v30  ;;  %v2881_v19 = vpop.f32.mrb[70].mxu0 }
 0x7f7   :  { %v3479_v21 = vpop.eup %3478  ;;  %v1723_v23 = vadd.f32 %v2881_v19, %v4464_v8  ;;  %v1717_v35 = vpop.f32.mrb[71].mxu0 }
 0x7f8   :  { %v3481_v26 = vpop.eup %3480  ;;  %v1718_v32 = vadd.f32 %v4464_v8, %v1717_v35  ;;  %v1783_v38 = vadd.f32 %v3479_v21, %v4294_v54 }
 0x7f9   :  { %3490 = vtanh.f32 %v1723_v23  ;;  %v1782_v36 = vadd.f32 %v3481_v26, %v4291_v53 }
 0x7fa   :  { %3492 = vtanh.f32 %v1718_v32  ;;  %v2884_v37 = vpop.f32.mrb[72].mxu0 }
 0x7fb   :  { %v3483_v39 = vpop.eup %3482  ;;  %v1733_v40 = vadd.f32 %v2884_v37, %v4464_v8  ;;  %v1727_v41 = vpop.f32.mrb[73].mxu0  ;;  %2926 = vmatprep.mubr.f32.mxu0 %v1782_v36 }
 0x7fc   :  { %v3485_v42 = vpop.eup %3484  ;;  %v1728_v43 = vadd.f32 %v4464_v8, %v1727_v41  ;;  %2927 = vmatmul.mubr.f32.vlgmr.msra.gmra.mrb[80].mxu0 %v1783_v38  ;;  %v1785_v53 = vadd.f32 %v3483_v39, %v4304_v50 }
 0x7fd   :  { %3494 = vtanh.f32 %v1733_v40  ;;  %v1784_v44 = vadd.f32 %v3485_v42, %v4301_v49 }
 0x7fe   :  { %3496 = vtanh.f32 %v1728_v43  ;;  %v2887_v47 = vpop.f32.mrb[74].mxu0 }
 0x7ff   :  { %v3487_v48 = vpop.eup %3486  ;;  %v1743_v51 = vadd.f32 %v2887_v47, %v4464_v8  ;;  %v1737_v54 = vpop.f32.mrb[75].mxu0  ;;  %2929 = vmatprep.mubr.f32.mxu0 %v1784_v44 }
 0x800   :  { %v3489_v52 = vpop.eup %3488  ;;  %v1738_v55 = vadd.f32 %v4464_v8, %v1737_v54  ;;  %2930 = vmatmul.mubr.f32.gmra.mrb[82].mxu0 %v1785_v53  ;;  %v1787_v49 = vadd.f32 %v3487_v48, %v4314_v46 }
 0x801   :  { %3498 = vtanh.f32 %v1743_v51  ;;  %v1786_v56 = vadd.f32 %v3489_v52, %v4311_v45 }
 0x802   :  { %3500 = vtanh.f32 %v1738_v55  ;;  %v2890_v61 = vpop.f32.mrb[76].mxu0 }
 0x803   :  { %v3491_v62 = vpop.eup %3490  ;;  %v1753_v57 = vadd.f32 %v2890_v61, %v4464_v8  ;;  %v1747_v50 = vpop.f32.mrb[77].mxu0  ;;  %2932 = vmatprep.mubr.f32.mxu0 %v1786_v56 }
 0x804   :  { %v3493_v58 = vpop.eup %3492  ;;  %v1748_v1 = vadd.f32 %v4464_v8, %v1747_v50  ;;  %2933 = vmatmul.mubr.f32.gmra.mrb[84].mxu0 %v1787_v49  ;;  %v1789_v45 = vadd.f32 %v3491_v62, %v4324_v60 }
 0x805   :  { %3502 = vtanh.f32 %v1753_v57  ;;  %v1788_v2 = vadd.f32 %v3493_v58, %v4321_v59 }
 0x806   :  { %3504 = vtanh.f32 %v1748_v1  ;;  %v2893_v5 = vpop.f32.mrb[78].mxu0 }
 0x807   :  { %v3495_v6 = vpop.eup %3494  ;;  %v1763_v9 = vadd.f32 %v2893_v5, %v4464_v8  ;;  %v1757_v46 = vpop.f32.mrb[79].mxu0  ;;  %2935 = vmatprep.mubr.f32.mxu1 %v1788_v2 }
 0x808   :  { %v3497_v10 = vpop.eup %3496  ;;  %v1758_v13 = vadd.f32 %v4464_v8, %v1757_v46  ;;  %2936 = vmatmul.mubr.f32.vlgmr.msra.gmra.mrb[64].mxu1 %v1789_v45  ;;  %v1791_v17 = vadd.f32 %v3495_v6, %v4334_v24 }
 0x809   :  { %3506 = vtanh.f32 %v1763_v9  ;;  %v1790_v14 = vadd.f32 %v3497_v10, %v4331_v63 }
 0x80a   :  { %3508 = vtanh.f32 %v1758_v13 }
 0x80b   :  { %v3499_v59 = vpop.eup %3498  ;;  %2938 = vmatprep.mubr.f32.mxu1 %v1790_v14 }
 0x80c   :  { %v3501_v18 = vpop.eup %3500  ;;  %2939 = vmatmul.mubr.f32.gmra.mrb[66].mxu1 %v1791_v17  ;;  %v1793_v22 = vadd.f32 %v3499_v59, %v4342_v28 }
 0x80d   :  { %v1792_v60 = vadd.f32 %v3501_v18, %v4339_v12  ;;  %v2114_v12 = vld [vmem:[%s4573_s8] ss:$0 sm:$0xff] }
 0x80f   :  { %v3503_v27 = vpop.eup %3502  ;;  %2941 = vmatprep.mubr.f32.mxu1 %v1792_v60 }
 0x810   :  { %v3505_v11 = vpop.eup %3504  ;;  %2942 = vmatmul.mubr.f32.gmra.mrb[68].mxu1 %v1793_v22  ;;  %v1795_v4 = vadd.f32 %v3503_v27, %v4350_v16 }
 0x811   :  { %v1794_v8 = vadd.f32 %v3505_v11, %v4347_v29 }
 0x813   :  { %v3507_v63 = vpop.eup %3506  ;;  %2944 = vmatprep.mubr.f32.mxu1 %v1794_v8 }
 0x814   :  { %v3509_v15 = vpop.eup %3508  ;;  %2945 = vmatmul.mubr.f32.gmra.mrb[70].mxu1 %v1795_v4  ;;  %v1797_v31 = vadd.f32 %v3507_v63, %v4358_v34 }
 0x815   :  { %v1796_v24 = vadd.f32 %v3509_v15, %v4355_v20 }
 0x817   :  { %2947 = vmatprep.mubr.f32.mxu1 %v1796_v24 }
 0x818   :  { %2948 = vmatmul.mubr.f32.gmra.mrb[72].mxu1 %v1797_v31 }
 0x8cf   :  { %v2928_v28 = vpop.f32.mrb[80].mxu0 }
 0x8d0   :  { %v1893_v7 = vadd.f32 %v2928_v28, %v2114_v12  ;;  %v1887_v29 = vpop.f32.mrb[81].mxu0 }
 0x8d1   :  { %v1888_v0 = vadd.f32 %v2114_v12, %v1887_v29 }
 0x8d2   :  { %1968 = vst.msk [vmem:[%s4574_s9 + $0x8] sm:$0xff] %vm1966_vm1, %v1893_v7 }
 0x8d3   :  { %1967 = vst.msk [vmem:[%s4574_s9] sm:$0xff] %vm1966_vm1, %v1888_v0  ;;  %v2931_v16 = vpop.f32.mrb[82].mxu0 }
 0x8d4   :  { %v1903_v20 = vadd.f32 %v2931_v16, %v2114_v12  ;;  %v1897_v34 = vpop.f32.mrb[83].mxu0 }
 0x8d5   :  { %v1898_v25 = vadd.f32 %v2114_v12, %v1897_v34 }
 0x8d6   :  { %1970 = vst.msk [vmem:[%s4574_s9 + $0x18] sm:$0xff] %vm1966_vm1, %v1903_v20 }
 0x8d7   :  { %1969 = vst.msk [vmem:[%s4574_s9 + $0x10] sm:$0xff] %vm1966_vm1, %v1898_v25  ;;  %v2934_v33 = vpop.f32.mrb[84].mxu0 }
 0x8d8   :  { %v1913_v3 = vadd.f32 %v2934_v33, %v2114_v12  ;;  %v1907_v30 = vpop.f32.mrb[85].mxu0 }
 0x8d9   :  { %v1908_v19 = vadd.f32 %v2114_v12, %v1907_v30 }
 0x8da   :  { %1972 = vst.msk [vmem:[%s4574_s9 + $0x28] sm:$0xff] %vm1966_vm1, %v1913_v3 }
 0x8db   :  { %1971 = vst.msk [vmem:[%s4574_s9 + $0x20] sm:$0xff] %vm1966_vm1, %v1908_v19  ;;  %v2937_v21 = vpop.f32.mrb[64].mxu1 }
 0x8dc   :  { %v1923_v23 = vadd.f32 %v2937_v21, %v2114_v12  ;;  %v1917_v35 = vpop.f32.mrb[65].mxu1 }
 0x8dd   :  { %v1918_v26 = vadd.f32 %v2114_v12, %v1917_v35 }
 0x8de   :  { %1974 = vst.msk [vmem:[%s4574_s9 + $0x38] sm:$0xff] %vm1966_vm1, %v1923_v23 }
 0x8df   :  { %1973 = vst.msk [vmem:[%s4574_s9 + $0x30] sm:$0xff] %vm1966_vm1, %v1918_v26  ;;  %v2940_v32 = vpop.f32.mrb[66].mxu1 }
 0x8e0   :  { %v1933_v36 = vadd.f32 %v2940_v32, %v2114_v12  ;;  %v1927_v37 = vpop.f32.mrb[67].mxu1 }
 0x8e1   :  { %v1928_v38 = vadd.f32 %v2114_v12, %v1927_v37 }
 0x8e2   :  { %1976 = vst.msk [vmem:[%s4574_s9 + $0x48] sm:$0xff] %vm1966_vm1, %v1933_v36 }
 0x8e3   :  { %1975 = vst.msk [vmem:[%s4574_s9 + $0x40] sm:$0xff] %vm1966_vm1, %v1928_v38  ;;  %v2943_v39 = vpop.f32.mrb[68].mxu1 }
 0x8e4   :  { %v1943_v40 = vadd.f32 %v2943_v39, %v2114_v12  ;;  %v1937_v41 = vpop.f32.mrb[69].mxu1 }
 0x8e5   :  { %v1938_v42 = vadd.f32 %v2114_v12, %v1937_v41 }
 0x8e6   :  { %1978 = vst.msk [vmem:[%s4574_s9 + $0x58] sm:$0xff] %vm1966_vm1, %v1943_v40 }
 0x8e7   :  { %1977 = vst.msk [vmem:[%s4574_s9 + $0x50] sm:$0xff] %vm1966_vm1, %v1938_v42  ;;  %v2946_v43 = vpop.f32.mrb[70].mxu1 }
 0x8e8   :  { %v1953_v44 = vadd.f32 %v2946_v43, %v2114_v12  ;;  %v1947_v47 = vpop.f32.mrb[71].mxu1 }
 0x8e9   :  { %v1948_v53 = vadd.f32 %v2114_v12, %v1947_v47 }
 0x8ea   :  { %1980 = vst.msk [vmem:[%s4574_s9 + $0x68] sm:$0xff] %vm1966_vm1, %v1953_v44 }
 0x8eb   :  { %1979 = vst.msk [vmem:[%s4574_s9 + $0x60] sm:$0xff] %vm1966_vm1, %v1948_v53  ;;  %v2949_v48 = vpop.f32.mrb[72].mxu1 }
 0x8ec   :  { %v1963_v51 = vadd.f32 %v2949_v48, %v2114_v12  ;;  %v1957_v54 = vpop.f32.mrb[73].mxu1 }
 0x8ed   :  { %v1958_v52 = vadd.f32 %v2114_v12, %v1957_v54 }
 0x8ee   :  { %1982 = vst.msk [vmem:[%s4574_s9 + $0x78] sm:$0xff] %vm1966_vm1, %v1963_v51 }
 0x8ef   :  { %1981 = vst.msk [vmem:[%s4574_s9 + $0x70] sm:$0xff] %vm1966_vm1, %v1958_v52 }

</bundles_post_ra>
